<compile_context>
chip_gen: v5e
topology: v5e:2x2
jax: 0.10.0
libtpu: 0.0.40
codegen_flags: <defaults>
</compile_context>

<pallas_src>
import functools
import math

import jax
import jax.numpy as jnp
from jax.experimental import pallas as pl
from jax.experimental.pallas import tpu as pltpu

F32 = jnp.float32
BF16 = jnp.bfloat16
VSPEC = pl.BlockSpec(memory_space=pltpu.MemorySpace.VMEM)  # whole array resident in VMEM
VMEM_LIMIT = 64 * 1024 * 1024


def _mxu(a, b):
    """MXU matmul: bf16 operands (no-op cast if already bf16), f32 accumulation."""
    return jnp.dot(a.astype(BF16), b.astype(BF16), preferred_element_type=F32)


# --------------------------------------------------------------------------------------
# Fused kernel 1: DeepEdgeFeatureGAT stack + GraphAttentionPooling for BOTH graphs
# (grid axis of size 2, "parallel" -> sharded across TensorCores on v7x)
# --------------------------------------------------------------------------------------
def _gnn_gap_kernel(x_ref, adj_ref, edge_ref, bmat_ref,
                    w_in_ref, b_in_ref, asrc_ref, adst_ref, aedge_ref, wstk_ref,
                    gapw_ref, o_ref,
                    *, num_layers, edge_dim, alpha, theta, neg_slope):
    # ----- input linear + ReLU -> h0 (tiny; kept in f32 for parity) -----
    x = x_ref[...].astype(F32)                                               # [N, F_in]
    h0 = jnp.maximum(
        jnp.dot(x, w_in_ref[...], preferred_element_type=F32) + b_in_ref[...], 0.0)

    # bf16 -> f32 casts hoisted OUT of the layer loop (were redone L*E times before)
    adj = adj_ref[...].astype(F32)                                           # [N, N] 0/1 mask
    mask_bias = jnp.where(adj > 0.0, 0.0, -1e30)
    edge_f = edge_ref[...].astype(F32)                                       # [E, N, N]

    asrc = asrc_ref[...]                                                     # [L, D] f32
    adst = adst_ref[...]                                                     # [L, D] f32
    aedge = aedge_ref[...]                                                   # [L, E] f32

    h = h0
    for l in range(num_layers):
        # --- edge logits a_edge.e_ij on the VPU from the VMEM-resident [E,N,N] slab ---
        elog = aedge[l:l + 1, 0:1] * edge_f[0]
        for e in range(1, edge_dim):
            elog = elog + aedge[l:l + 1, e:e + 1] * edge_f[e]

        # --- attention logits: a_src.h_i (VPU/XLU reduce) + a_dst.h_j + a_edge.e_ij ---
        src = jnp.sum(h * asrc[l:l + 1, :], axis=-1, keepdims=True)          # [N, 1]
        dst = jnp.einsum("od,nd->on", adst[l:l + 1, :], h,
                         preferred_element_type=F32)                         # [1, N]
        logits = src + dst + elog
        logits = jnp.where(logits >= 0.0, logits, neg_slope * logits)        # LeakyReLU
        logits = logits + mask_bias                                          # mask non-edges
        logits = logits - jnp.max(logits, axis=-1, keepdims=True)
        p = jnp.exp(logits)                                                  # masked entries underflow to 0
        attw = p * pl.reciprocal(jnp.sum(p, axis=-1, keepdims=True), approx=True)

        # --- propagate + GCNII-style residual & identity-mapped weight (bf16 MXU, f32 acc) ---
        prop = _mxu(attw, h)                                                 # [N, D]
        beta = math.log(theta / (l + 1) + 1.0)
        hnew = (1.0 - alpha) * prop + alpha * h0
        hnew = (1.0 - beta) * hnew + beta * _mxu(hnew, wstk_ref[l])          # wstk already bf16
        h = jnp.maximum(hnew, 0.0)

    # ----- GraphAttentionPooling (SimGNN-style), fused to avoid the [N,D] HBM round trip -----
    bmat = bmat_ref[...]                                                     # [G, N] one-hot membership
    counts = jnp.sum(bmat, axis=-1, keepdims=True)                           # [G, 1]
    mean = _mxu(bmat, h) / counts                                            # exact division (cheap)
    tg = jnp.tanh(_mxu(mean, gapw_ref[...]))                                 # [G, D]
    # gate[n] = sigmoid(h[n] . tg[graph(n)]); with one-hot bmat this equals the per-node gate.
    s = jnp.einsum("gd,nd->gn", tg.astype(BF16), h.astype(BF16),
                   preferred_element_type=F32)                               # [G, N]
    wts = bmat * jax.nn.sigmoid(s)                                           # [G, N]
    o_ref[...] = _mxu(wts, h).astype(o_ref.dtype)


def gnn_gap_forward(gs, *, num_layers, alpha, theta, neg_slope=0.2):
    """gs: dict of arrays stacked along a leading 'graph-set' axis of size 2 (p-net, v-net)."""
    S, N, Fdim = gs["x"].shape
    E = gs["edge"].shape[1]
    G = gs["bmat"].shape[1]
    D = gs["w_in"].shape[-1]
    L = num_layers
    kernel = functools.partial(_gnn_gap_kernel, num_layers=L, edge_dim=E,
                               alpha=alpha, theta=theta, neg_slope=neg_slope)

    def im3(s):  # 3-D arrays: one block per graph-set, whole array otherwise
        return (s, 0, 0)

    def im4(s):  # 4-D arrays
        return (s, 0, 0, 0)

    grid_spec = pltpu.PrefetchScalarGridSpec(
        num_scalar_prefetch=0,
        grid=(S,),
        in_specs=[
            pl.BlockSpec((None, N, Fdim), im3),      # x
            pl.BlockSpec((None, N, N), im3),         # adj (bf16)
            pl.BlockSpec((None, E, N, N), im4),      # edge (bf16)
            pl.BlockSpec((None, G, N), im3),         # bmat
            pl.BlockSpec((None, Fdim, D), im3),      # lin_in_w
            pl.BlockSpec((None, 1, D), im3),         # lin_in_b
            pl.BlockSpec((None, L, D), im3),         # a_src
            pl.BlockSpec((None, L, D), im3),         # a_dst
            pl.BlockSpec((None, L, E), im3),         # a_edge
            pl.BlockSpec((None, L, D, D), im4),      # w_stk (bf16)
            pl.BlockSpec((None, D, D), im3),         # gap_w (bf16)
        ],
        out_specs=pl.BlockSpec((None, G, D), im3),
    )
    return pl.pallas_call(
        kernel,
        out_shape=jax.ShapeDtypeStruct((S, G, D), F32),
        grid_spec=grid_spec,
        compiler_params=pltpu.CompilerParams(
            dimension_semantics=("parallel",),
            vmem_limit_bytes=VMEM_LIMIT),
    )(gs["x"], gs["adj"], gs["edge"], gs["bmat"], gs["w_in"], gs["b_in"],
      gs["a_src"], gs["a_dst"], gs["a_edge"], gs["w_stk"], gs["gap_w"])


# --------------------------------------------------------------------------------------
# Fused kernel 2: mlp_v_net_attrs + concat + mlp_fusion + GRUCell
# (fw2 of mlp_fusion is folded host-side into the GRU input projection)
# --------------------------------------------------------------------------------------
def _tail_kernel(emb_ref, attrs_ref, hid_ref,
                 aw0_ref, ab0_ref, aw1_ref, ab1_ref,
                 fw0_ref, fb0_ref, fw1_ref, fb1_ref,
                 wzi_ref, bzi_ref, whh_ref, bhh_ref, o_ref,
                 *, emb_dim, hidden_dim):
    p_emb = emb_ref[0]                                                       # [G, D]
    v_emb = emb_ref[1]                                                       # [G, D]

    # ----- mlp_v_net_attrs: Linear -> ReLU -> Linear -----
    a = jnp.maximum(_mxu(attrs_ref[...], aw0_ref[...]) + ab0_ref[...], 0.0)
    attrs_emb = _mxu(a, aw1_ref[...]) + ab1_ref[...]

    # ----- mlp_fusion: the concat is folded into a split-weight first matmul -----
    D = emb_dim
    z = (_mxu(p_emb, fw0_ref[0:D, :])
         + _mxu(v_emb, fw0_ref[D:2 * D, :])
         + _mxu(attrs_emb, fw0_ref[2 * D:3 * D, :])
         + fb0_ref[...])
    z = jnp.maximum(z, 0.0)
    z = jnp.maximum(_mxu(z, fw1_ref[...]) + fb1_ref[...], 0.0)

    # ----- GRUCell (PyTorch gate order r, z, n); fw2/fb2 already folded into wzi/bzi -----
    h = hid_ref[...]
    gi = _mxu(z, wzi_ref[...]) + bzi_ref[...]                                # [G, 3H]
    gh = _mxu(h, whh_ref[...]) + bhh_ref[...]                                # [G, 3H]
    H = hidden_dim
    r = jax.nn.sigmoid(gi[:, :H] + gh[:, :H])
    zg = jax.nn.sigmoid(gi[:, H:2 * H] + gh[:, H:2 * H])
    n = jnp.tanh(gi[:, 2 * H:] + r * gh[:, 2 * H:])
    o_ref[...] = ((1.0 - zg) * n + zg * h).astype(o_ref.dtype)


def tail_forward(emb_all, v_attrs, hidden, tp, *, emb_dim, hidden_dim):
    g = hidden.shape[0]
    kernel = functools.partial(_tail_kernel, emb_dim=emb_dim, hidden_dim=hidden_dim)
    return pl.pallas_call(
        kernel,
        out_shape=jax.ShapeDtypeStruct((g, hidden_dim), F32),
        in_specs=[VSPEC] * 15,
        out_specs=VSPEC,
        compiler_params=pltpu.CompilerParams(vmem_limit_bytes=VMEM_LIMIT),
    )(emb_all, v_attrs, hidden,
      tp["aw0"], tp["ab0"], tp["aw1"], tp["ab1"],
      tp["fw0"], tp["fb0"], tp["fw1"], tp["fb1"],
      tp["w_zi"], tp["b_zi"], tp["w_hh"], tp["b_hh"])


# --------------------------------------------------------------------------------------
# Host-side packing (done once per parameter set): pad v-graph to p-graph shape, stack the
# two graph sets along a leading axis, cast big weights / dense slabs to bf16, fold fw2 -> GRU.
# --------------------------------------------------------------------------------------
def _pad_to(a, shape):
    return jnp.pad(a, [(0, t - s) for s, t in zip(a.shape, shape)])


def pack_graph_side(graph, gnn, gap_w, *, n_nodes, node_dim, edge_dim):
    x, adj, edge, bmat = graph
    nv = x.shape[0]
    x_p = _pad_to(x, (n_nodes, node_dim))
    adj_p = _pad_to(adj.astype(F32), (n_nodes, n_nodes))
    if nv < n_nodes:
        # Self-loops on padded rows keep the masked softmax finite; padded nodes are zeroed
        # by bmat in the pooling so the result is unchanged.
        adj_p = adj_p + jnp.diag((jnp.arange(n_nodes) >= nv).astype(F32))
    edge_p = _pad_to(edge.astype(F32), (edge_dim, n_nodes, n_nodes))
    bmat_p = _pad_to(bmat, (bmat.shape[0], n_nodes))
    w_in_p = _pad_to(gnn["lin_in_w"], (node_dim, gnn["lin_in_w"].shape[1]))
    a_edge_p = _pad_to(gnn["a_edge"], (gnn["a_edge"].shape[0], edge_dim))
    return dict(x=x_p, adj=adj_p.astype(BF16), edge=edge_p.astype(BF16), bmat=bmat_p,
                w_in=w_in_p, b_in=gnn["lin_in_b"],
                a_src=gnn["a_src"], a_dst=gnn["a_dst"], a_edge=a_edge_p,
                w_stk=gnn["w"].astype(BF16), gap_w=gap_w.astype(BF16))


def pack_graph_sets(p_graph, v_graph, params):
    n = max(p_graph[0].shape[0], v_graph[0].shape[0])
    f = max(p_graph[0].shape[1], v_graph[0].shape[1])
    e = max(p_graph[2].shape[0], v_graph[2].shape[0])
    p_side = pack_graph_side(p_graph, params["gnn_p"], params["gap_p_w"],
                             n_nodes=n, node_dim=f, edge_dim=e)
    v_side = pack_graph_side(v_graph, params["gnn_v"], params["gap_v_w"],
                             n_nodes=n, node_dim=f, edge_dim=e)
    return {k: jnp.stack([p_side[k], v_side[k]], axis=0) for k in p_side}


def prepare_tail_params(params):
    (aw0, ab0), (aw1, ab1) = params["mlp_v_net_attrs"]
    (fw0, fb0), (fw1, fb1), (fw2, fb2) = params["mlp_fusion"]
    gru = params["gru"]
    # Fold the last fusion Linear into the GRU input projection (fusion_emb is not an output):
    #   gi = (z @ fw2 + fb2) @ w_ih + b_ih = z @ (fw2 @ w_ih) + (fb2 @ w_ih + b_ih)
    w_zi = fw2 @ gru["w_ih"]
    b_zi = fb2 @ gru["w_ih"] + gru["b_ih"]
    return dict(aw0=aw0.astype(BF16), ab0=ab0, aw1=aw1.astype(BF16), ab1=ab1,
                fw0=fw0.astype(BF16), fb0=fb0, fw1=fw1.astype(BF16), fb1=fb1,
                w_zi=w_zi.astype(BF16), b_zi=b_zi,
                w_hh=gru["w_hh"].astype(BF16), b_hh=gru["b_hh"])


# --------------------------------------------------------------------------------------
# Module-level forward: 2 pallas_calls total
# --------------------------------------------------------------------------------------
def upper_basic_net_forward(params, p_graph, v_graph, v_net_attrs, hidden, cfg):
    gs = pack_graph_sets(p_graph, v_graph, params)
    emb_all = gnn_gap_forward(gs, num_layers=cfg["num_gnn_layers"],
                              alpha=cfg["alpha"], theta=cfg["theta"])
    tp = prepare_tail_params(params)
    return tail_forward(emb_all, v_net_attrs, hidden, tp,
                        emb_dim=cfg["embedding_dim"], hidden_dim=cfg["hidden_dim"])


# --------------------------------------------------------------------------------------
# Deterministic parameter / input construction
# --------------------------------------------------------------------------------------
def _w(key, shape, scale=0.2):
    return (scale * jax.random.normal(key, shape)).astype(F32)


def init_gat_params(key, in_dim, emb_dim, edge_dim, num_layers):
    k = jax.random.split(key, 5)
    return {
        "lin_in_w": _w(k[0], (in_dim, emb_dim)),
        "lin_in_b": jnp.zeros((1, emb_dim), F32),
        # per-layer parameters stacked along a leading layer axis -> single fused kernel
        "a_src": _w(k[1], (num_layers, emb_dim)),
        "a_dst": _w(k[2], (num_layers, emb_dim)),
        "a_edge": _w(k[3], (num_layers, edge_dim)),
        "w": _w(k[4], (num_layers, emb_dim, emb_dim)),
    }


def init_mlp_params(key, dims):
    layers = []
    keys = jax.random.split(key, len(dims) - 1)
    for i in range(len(dims) - 1):
        layers.append((_w(keys[i], (dims[i], dims[i + 1])),
                       jnp.zeros((1, dims[i + 1]), F32)))
    return layers


def init_gru_params(key, in_dim, hid_dim):
    k = jax.random.split(key, 4)
    return {
        "w_ih": _w(k[0], (in_dim, 3 * hid_dim)),
        "w_hh": _w(k[1], (hid_dim, 3 * hid_dim)),
        "b_ih": _w(k[2], (1, 3 * hid_dim), 0.05),
        "b_hh": _w(k[3], (1, 3 * hid_dim), 0.05),
    }


def make_dense_graph(key, n_graphs, nodes_per_graph, node_dim, edge_dim):
    n = n_graphs * nodes_per_graph
    kx, ke = jax.random.split(key)
    x = jax.random.normal(kx, (n, node_dim)).astype(F32)
    adj = jnp.zeros((n, n), F32)
    bmat = jnp.zeros((n_graphs, n), F32)
    for g in range(n_graphs):
        off = g * nodes_per_graph
        bmat = bmat.at[g, off:off + nodes_per_graph].set(1.0)
        for i in range(nodes_per_graph):
            j = (i + 1) % nodes_per_graph
            adj = adj.at[off + i, off + j].set(1.0)
            adj = adj.at[off + j, off + i].set(1.0)
            adj = adj.at[off + i, off + i].set(1.0)       # self loop (every row has an edge)
    edge = jax.random.normal(ke, (edge_dim, n, n)).astype(F32) * adj[None, :, :]
    return x, adj, edge, bmat


# --------------------------------------------------------------------------------------
if __name__ == "__main__":
    cfg = dict(
        p_net_node_dim=4, p_net_edge_dim=2,
        v_net_node_dim=3, v_net_edge_dim=2,
        v_net_attrs_dim=6,
        num_gnn_layers=5, alpha=0.2, theta=0.2,
        embedding_dim=128, hidden_dim=128,    # module defaults; lane-width (128) aligned
    )
    G = 2               # graphs per batch
    P_NODES = 8         # nodes per physical graph -> 16 total
    V_NODES = 4         # nodes per virtual graph  ->  8 total (zero-padded to 16 in packing)

    root = jax.random.PRNGKey(0)
    (k_pg, k_vg, k_attr, k_hid,
     k_p1, k_p2, k_p3, k_p4, k_p5, k_p6, k_p7) = jax.random.split(root, 11)

    p_graph = make_dense_graph(k_pg, G, P_NODES, cfg["p_net_node_dim"], cfg["p_net_edge_dim"])
    v_graph = make_dense_graph(k_vg, G, V_NODES, cfg["v_net_node_dim"], cfg["v_net_edge_dim"])
    v_net_attrs = jax.random.normal(k_attr, (G, cfg["v_net_attrs_dim"])).astype(F32)
    hidden = jax.random.normal(k_hid, (G, cfg["hidden_dim"])).astype(F32)

    emb = cfg["embedding_dim"]
    params = {
        "gnn_p": init_gat_params(k_p1, cfg["p_net_node_dim"], emb, cfg["p_net_edge_dim"],
                                 cfg["num_gnn_layers"]),
        "gnn_v": init_gat_params(k_p2, cfg["v_net_node_dim"], emb, cfg["v_net_edge_dim"],
                                 cfg["num_gnn_layers"]),
        "gap_p_w": _w(k_p3, (emb, emb)),
        "gap_v_w": _w(k_p4, (emb, emb)),
        "mlp_v_net_attrs": init_mlp_params(k_p5, [cfg["v_net_attrs_dim"], emb, emb]),
        "mlp_fusion": init_mlp_params(k_p6, [emb * 3, emb * 2, emb, emb]),
        "gru": init_gru_params(k_p7, emb, cfg["hidden_dim"]),
    }

    new_hidden = upper_basic_net_forward(params, p_graph, v_graph, v_net_attrs, hidden, cfg)
    new_hidden = jax.block_until_ready(new_hidden)

    assert new_hidden.shape == (G, cfg["hidden_dim"])
    assert bool(jnp.all(jnp.isfinite(new_hidden)))
    print("KERNEL_OK")
</pallas_src>

<mosaic_0001>
module attributes {stable_mosaic.version = 11 : i64} {
  func.func @_gnn_gap_kernel(%arg0: i32, %arg1: memref<1x16x4xf32, #tpu.memory_space<vmem>>, %arg2: memref<1x16x16xbf16, #tpu.memory_space<vmem>>, %arg3: memref<1x2x16x16xbf16, #tpu.memory_space<vmem>>, %arg4: memref<1x2x16xf32, #tpu.memory_space<vmem>>, %arg5: memref<1x4x128xf32, #tpu.memory_space<vmem>>, %arg6: memref<1x1x128xf32, #tpu.memory_space<vmem>>, %arg7: memref<1x5x128xf32, #tpu.memory_space<vmem>>, %arg8: memref<1x5x128xf32, #tpu.memory_space<vmem>>, %arg9: memref<1x5x2xf32, #tpu.memory_space<vmem>>, %arg10: memref<1x5x128x128xbf16, #tpu.memory_space<vmem>>, %arg11: memref<1x128x128xbf16, #tpu.memory_space<vmem>>, %arg12: memref<1x2x128xf32, #tpu.memory_space<vmem>>) attributes {dimension_semantics = [#tpu.dimension_semantics<parallel>], iteration_bounds = array<i64: 2>, scalar_prefetch = 0 : i64, scratch_operands = 0 : i64, tpu.core_type = #tpu.core_type<tc>, window_params = [{transform_indices = @transform_0, window_bounds = array<i64: 1, 16, 4>}, {transform_indices = @transform_1, window_bounds = array<i64: 1, 16, 16>}, {transform_indices = @transform_2, window_bounds = array<i64: 1, 2, 16, 16>}, {transform_indices = @transform_3, window_bounds = array<i64: 1, 2, 16>}, {transform_indices = @transform_4, window_bounds = array<i64: 1, 4, 128>}, {transform_indices = @transform_5, window_bounds = array<i64: 1, 1, 128>}, {transform_indices = @transform_6, window_bounds = array<i64: 1, 5, 128>}, {transform_indices = @transform_7, window_bounds = array<i64: 1, 5, 128>}, {transform_indices = @transform_8, window_bounds = array<i64: 1, 5, 2>}, {transform_indices = @transform_9, window_bounds = array<i64: 1, 5, 128, 128>}, {transform_indices = @transform_10, window_bounds = array<i64: 1, 128, 128>}, {transform_indices = @transform_11, window_bounds = array<i64: 1, 2, 128>}]} {
    %c0 = arith.constant 0 : index
    %c0_0 = arith.constant 0 : index
    %c0_1 = arith.constant 0 : index
    %0 = vector.load %arg1[%c0, %c0_0, %c0_1] : memref<1x16x4xf32, #tpu.memory_space<vmem>>, vector<1x16x4xf32>
    %1 = vector.shape_cast %0 : vector<1x16x4xf32> to vector<16x4xf32>
    %c0_2 = arith.constant 0 : index
    %c0_3 = arith.constant 0 : index
    %c0_4 = arith.constant 0 : index
    %2 = vector.load %arg5[%c0_2, %c0_3, %c0_4] : memref<1x4x128xf32, #tpu.memory_space<vmem>>, vector<1x4x128xf32>
    %3 = vector.shape_cast %2 : vector<1x4x128xf32> to vector<4x128xf32>
    %cst = arith.constant dense<0.000000e+00> : vector<16x128xf32>
    %4 = tpu.matmul %1, %3, %cst {dimension_numbers = #tpu.dot_dimension_numbers<[1], [0], [0], [1], [0, 0, 1, 1], [], []>} : vector<16x4xf32>, vector<4x128xf32>, vector<16x128xf32> -> vector<16x128xf32>
    %c0_5 = arith.constant 0 : index
    %c0_6 = arith.constant 0 : index
    %c0_7 = arith.constant 0 : index
    %5 = vector.load %arg6[%c0_5, %c0_6, %c0_7] : memref<1x1x128xf32, #tpu.memory_space<vmem>>, vector<1x1x128xf32>
    %6 = vector.shape_cast %5 : vector<1x1x128xf32> to vector<1x128xf32>
    %7 = vector.broadcast %6 : vector<1x128xf32> to vector<16x128xf32>
    %8 = arith.addf %4, %7 : vector<16x128xf32>
    %cst_8 = arith.constant 0.000000e+00 : f32
    %9 = vector.broadcast %cst_8 : f32 to vector<16x128xf32>
    %10 = arith.maximumf %8, %9 : vector<16x128xf32>
    %c0_9 = arith.constant 0 : index
    %c0_10 = arith.constant 0 : index
    %c0_11 = arith.constant 0 : index
    %11 = vector.load %arg2[%c0_9, %c0_10, %c0_11] : memref<1x16x16xbf16, #tpu.memory_space<vmem>>, vector<1x16x16xbf16>
    %12 = vector.shape_cast %11 : vector<1x16x16xbf16> to vector<16x16xbf16>
    %13 = arith.extf %12 : vector<16x16xbf16> to vector<16x16xf32>
    %cst_12 = arith.constant 0.000000e+00 : f32
    %14 = vector.broadcast %cst_12 : f32 to vector<16x16xf32>
    %15 = arith.cmpf ogt, %13, %14 : vector<16x16xf32>
    %cst_13 = arith.constant 0.000000e+00 : f32
    %cst_14 = arith.constant -1.000000e+30 : f32
    %16 = vector.broadcast %cst_13 : f32 to vector<16x16xf32>
    %17 = vector.broadcast %cst_14 : f32 to vector<16x16xf32>
    %18 = arith.select %15, %16, %17 : vector<16x16xi1>, vector<16x16xf32>
    %c0_15 = arith.constant 0 : index
    %c0_16 = arith.constant 0 : index
    %c0_17 = arith.constant 0 : index
    %c0_18 = arith.constant 0 : index
    %19 = vector.load %arg3[%c0_15, %c0_16, %c0_17, %c0_18] : memref<1x2x16x16xbf16, #tpu.memory_space<vmem>>, vector<1x2x16x16xbf16>
    %20 = vector.shape_cast %19 : vector<1x2x16x16xbf16> to vector<2x16x16xbf16>
    %21 = arith.extf %20 : vector<2x16x16xbf16> to vector<2x16x16xf32>
    %c0_19 = arith.constant 0 : index
    %c0_20 = arith.constant 0 : index
    %c0_21 = arith.constant 0 : index
    %22 = vector.load %arg7[%c0_19, %c0_20, %c0_21] : memref<1x5x128xf32, #tpu.memory_space<vmem>>, vector<1x5x128xf32>
    %23 = vector.shape_cast %22 : vector<1x5x128xf32> to vector<5x128xf32>
    %c0_22 = arith.constant 0 : index
    %c0_23 = arith.constant 0 : index
    %c0_24 = arith.constant 0 : index
    %24 = vector.load %arg8[%c0_22, %c0_23, %c0_24] : memref<1x5x128xf32, #tpu.memory_space<vmem>>, vector<1x5x128xf32>
    %25 = vector.shape_cast %24 : vector<1x5x128xf32> to vector<5x128xf32>
    %c0_25 = arith.constant 0 : index
    %c0_26 = arith.constant 0 : index
    %c0_27 = arith.constant 0 : index
    %26 = vector.load %arg9[%c0_25, %c0_26, %c0_27] : memref<1x5x2xf32, #tpu.memory_space<vmem>>, vector<1x5x2xf32>
    %27 = vector.shape_cast %26 : vector<1x5x2xf32> to vector<5x2xf32>
    %28 = vector.extract_strided_slice %27 {offsets = [0, 0], sizes = [1, 1], strides = [1, 1]} : vector<5x2xf32> to vector<1x1xf32>
    %29 = vector.extract_strided_slice %21 {offsets = [0, 0, 0], sizes = [1, 16, 16], strides = [1, 1, 1]} : vector<2x16x16xf32> to vector<1x16x16xf32>
    %30 = vector.shape_cast %29 : vector<1x16x16xf32> to vector<16x16xf32>
    %31 = vector.broadcast %28 : vector<1x1xf32> to vector<16x16xf32>
    %32 = arith.mulf %31, %30 : vector<16x16xf32>
    %33 = vector.extract_strided_slice %27 {offsets = [0, 1], sizes = [1, 1], strides = [1, 1]} : vector<5x2xf32> to vector<1x1xf32>
    %34 = vector.extract_strided_slice %21 {offsets = [1, 0, 0], sizes = [1, 16, 16], strides = [1, 1, 1]} : vector<2x16x16xf32> to vector<1x16x16xf32>
    %35 = vector.shape_cast %34 : vector<1x16x16xf32> to vector<16x16xf32>
    %36 = vector.broadcast %33 : vector<1x1xf32> to vector<16x16xf32>
    %37 = arith.mulf %36, %35 : vector<16x16xf32>
    %38 = arith.addf %32, %37 : vector<16x16xf32>
    %39 = vector.extract_strided_slice %23 {offsets = [0, 0], sizes = [1, 128], strides = [1, 1]} : vector<5x128xf32> to vector<1x128xf32>
    %40 = vector.broadcast %39 : vector<1x128xf32> to vector<16x128xf32>
    %41 = arith.mulf %10, %40 : vector<16x128xf32>
    %cst_28 = arith.constant dense<0.000000e+00> : vector<16xf32>
    %42 = vector.multi_reduction <add>, %41, %cst_28 [1] : vector<16x128xf32> to vector<16xf32>
    %43 = vector.shape_cast %42 : vector<16xf32> to vector<16x1xf32>
    %44 = vector.extract_strided_slice %25 {offsets = [0, 0], sizes = [1, 128], strides = [1, 1]} : vector<5x128xf32> to vector<1x128xf32>
    "tpu.trace_start"() <{level = 10 : i32, message = "od,nd->on"}> : () -> ()
    %cst_29 = arith.constant dense<0.000000e+00> : vector<1x16xf32>
    %45 = tpu.matmul %44, %10, %cst_29 {dimension_numbers = #tpu.dot_dimension_numbers<[1], [1], [0], [0], [0, 0, 1, 0], [], []>} : vector<1x128xf32>, vector<16x128xf32>, vector<1x16xf32> -> vector<1x16xf32>
    "tpu.trace_stop"() : () -> ()
    %46 = vector.broadcast %43 : vector<16x1xf32> to vector<16x16xf32>
    %47 = vector.broadcast %45 : vector<1x16xf32> to vector<16x16xf32>
    %48 = arith.addf %46, %47 : vector<16x16xf32>
    %49 = arith.addf %48, %38 : vector<16x16xf32>
    %cst_30 = arith.constant 0.000000e+00 : f32
    %50 = vector.broadcast %cst_30 : f32 to vector<16x16xf32>
    %51 = arith.cmpf oge, %49, %50 : vector<16x16xf32>
    %cst_31 = arith.constant 2.000000e-01 : f32
    %52 = vector.broadcast %cst_31 : f32 to vector<16x16xf32>
    %53 = arith.mulf %52, %49 : vector<16x16xf32>
    %54 = arith.select %51, %49, %53 : vector<16x16xi1>, vector<16x16xf32>
    %55 = arith.addf %54, %18 : vector<16x16xf32>
    %cst_32 = arith.constant dense<0xFF800000> : vector<16xf32>
    %56 = vector.multi_reduction <maximumf>, %55, %cst_32 [1] : vector<16x16xf32> to vector<16xf32>
    %57 = vector.shape_cast %56 : vector<16xf32> to vector<16x1xf32>
    %58 = vector.broadcast %57 : vector<16x1xf32> to vector<16x16xf32>
    %59 = arith.subf %55, %58 : vector<16x16xf32>
    %60 = math.exp %59 : vector<16x16xf32>
    %cst_33 = arith.constant dense<0.000000e+00> : vector<16xf32>
    %61 = vector.multi_reduction <add>, %60, %cst_33 [1] : vector<16x16xf32> to vector<16xf32>
    %62 = vector.shape_cast %61 : vector<16xf32> to vector<16x1xf32>
    %63 = tpu.reciprocal %62 {approx = true} : vector<16x1xf32> -> vector<16x1xf32>
    %64 = vector.broadcast %63 : vector<16x1xf32> to vector<16x16xf32>
    %65 = arith.mulf %60, %64 : vector<16x16xf32>
    %66 = arith.truncf %65 : vector<16x16xf32> to vector<16x16xbf16>
    %67 = arith.truncf %10 : vector<16x128xf32> to vector<16x128xbf16>
    %cst_34 = arith.constant dense<0.000000e+00> : vector<16x128xf32>
    %68 = tpu.matmul %66, %67, %cst_34 {dimension_numbers = #tpu.dot_dimension_numbers<[1], [0], [0], [1], [0, 0, 1, 1], [], []>} : vector<16x16xbf16>, vector<16x128xbf16>, vector<16x128xf32> -> vector<16x128xf32>
    %cst_35 = arith.constant 8.000000e-01 : f32
    %69 = vector.broadcast %cst_35 : f32 to vector<16x128xf32>
    %70 = arith.mulf %69, %68 : vector<16x128xf32>
    %cst_36 = arith.constant 2.000000e-01 : f32
    %71 = vector.broadcast %cst_36 : f32 to vector<16x128xf32>
    %72 = arith.mulf %71, %10 : vector<16x128xf32>
    %73 = arith.addf %70, %72 : vector<16x128xf32>
    %cst_37 = arith.constant 0.817678452 : f32
    %74 = vector.broadcast %cst_37 : f32 to vector<16x128xf32>
    %75 = arith.mulf %74, %73 : vector<16x128xf32>
    %c0_38 = arith.constant 0 : index
    %c0_39 = arith.constant 0 : index
    %c0_40 = arith.constant 0 : index
    %c0_41 = arith.constant 0 : index
    %76 = vector.load %arg10[%c0_38, %c0_39, %c0_40, %c0_41] : memref<1x5x128x128xbf16, #tpu.memory_space<vmem>>, vector<1x1x128x128xbf16>
    %77 = vector.shape_cast %76 : vector<1x1x128x128xbf16> to vector<128x128xbf16>
    %78 = arith.truncf %73 : vector<16x128xf32> to vector<16x128xbf16>
    %cst_42 = arith.constant dense<0.000000e+00> : vector<16x128xf32>
    %79 = tpu.matmul %78, %77, %cst_42 {dimension_numbers = #tpu.dot_dimension_numbers<[1], [0], [0], [1], [0, 0, 1, 1], [], []>} : vector<16x128xbf16>, vector<128x128xbf16>, vector<16x128xf32> -> vector<16x128xf32>
    %cst_43 = arith.constant 0.182321563 : f32
    %80 = vector.broadcast %cst_43 : f32 to vector<16x128xf32>
    %81 = arith.mulf %80, %79 : vector<16x128xf32>
    %82 = arith.addf %75, %81 : vector<16x128xf32>
    %cst_44 = arith.constant 0.000000e+00 : f32
    %83 = vector.broadcast %cst_44 : f32 to vector<16x128xf32>
    %84 = arith.maximumf %82, %83 : vector<16x128xf32>
    %85 = vector.extract_strided_slice %27 {offsets = [1, 0], sizes = [1, 1], strides = [1, 1]} : vector<5x2xf32> to vector<1x1xf32>
    %86 = vector.extract_strided_slice %21 {offsets = [0, 0, 0], sizes = [1, 16, 16], strides = [1, 1, 1]} : vector<2x16x16xf32> to vector<1x16x16xf32>
    %87 = vector.shape_cast %86 : vector<1x16x16xf32> to vector<16x16xf32>
    %88 = vector.broadcast %85 : vector<1x1xf32> to vector<16x16xf32>
    %89 = arith.mulf %88, %87 : vector<16x16xf32>
    %90 = vector.extract_strided_slice %27 {offsets = [1, 1], sizes = [1, 1], strides = [1, 1]} : vector<5x2xf32> to vector<1x1xf32>
    %91 = vector.extract_strided_slice %21 {offsets = [1, 0, 0], sizes = [1, 16, 16], strides = [1, 1, 1]} : vector<2x16x16xf32> to vector<1x16x16xf32>
    %92 = vector.shape_cast %91 : vector<1x16x16xf32> to vector<16x16xf32>
    %93 = vector.broadcast %90 : vector<1x1xf32> to vector<16x16xf32>
    %94 = arith.mulf %93, %92 : vector<16x16xf32>
    %95 = arith.addf %89, %94 : vector<16x16xf32>
    %96 = vector.extract_strided_slice %23 {offsets = [1, 0], sizes = [1, 128], strides = [1, 1]} : vector<5x128xf32> to vector<1x128xf32>
    %97 = vector.broadcast %96 : vector<1x128xf32> to vector<16x128xf32>
    %98 = arith.mulf %84, %97 : vector<16x128xf32>
    %cst_45 = arith.constant dense<0.000000e+00> : vector<16xf32>
    %99 = vector.multi_reduction <add>, %98, %cst_45 [1] : vector<16x128xf32> to vector<16xf32>
    %100 = vector.shape_cast %99 : vector<16xf32> to vector<16x1xf32>
    %101 = vector.extract_strided_slice %25 {offsets = [1, 0], sizes = [1, 128], strides = [1, 1]} : vector<5x128xf32> to vector<1x128xf32>
    "tpu.trace_start"() <{level = 10 : i32, message = "od,nd->on"}> : () -> ()
    %cst_46 = arith.constant dense<0.000000e+00> : vector<1x16xf32>
    %102 = tpu.matmul %101, %84, %cst_46 {dimension_numbers = #tpu.dot_dimension_numbers<[1], [1], [0], [0], [0, 0, 1, 0], [], []>} : vector<1x128xf32>, vector<16x128xf32>, vector<1x16xf32> -> vector<1x16xf32>
    "tpu.trace_stop"() : () -> ()
    %103 = vector.broadcast %100 : vector<16x1xf32> to vector<16x16xf32>
    %104 = vector.broadcast %102 : vector<1x16xf32> to vector<16x16xf32>
    %105 = arith.addf %103, %104 : vector<16x16xf32>
    %106 = arith.addf %105, %95 : vector<16x16xf32>
    %cst_47 = arith.constant 0.000000e+00 : f32
    %107 = vector.broadcast %cst_47 : f32 to vector<16x16xf32>
    %108 = arith.cmpf oge, %106, %107 : vector<16x16xf32>
    %cst_48 = arith.constant 2.000000e-01 : f32
    %109 = vector.broadcast %cst_48 : f32 to vector<16x16xf32>
    %110 = arith.mulf %109, %106 : vector<16x16xf32>
    %111 = arith.select %108, %106, %110 : vector<16x16xi1>, vector<16x16xf32>
    %112 = arith.addf %111, %18 : vector<16x16xf32>
    %cst_49 = arith.constant dense<0xFF800000> : vector<16xf32>
    %113 = vector.multi_reduction <maximumf>, %112, %cst_49 [1] : vector<16x16xf32> to vector<16xf32>
    %114 = vector.shape_cast %113 : vector<16xf32> to vector<16x1xf32>
    %115 = vector.broadcast %114 : vector<16x1xf32> to vector<16x16xf32>
    %116 = arith.subf %112, %115 : vector<16x16xf32>
    %117 = math.exp %116 : vector<16x16xf32>
    %cst_50 = arith.constant dense<0.000000e+00> : vector<16xf32>
    %118 = vector.multi_reduction <add>, %117, %cst_50 [1] : vector<16x16xf32> to vector<16xf32>
    %119 = vector.shape_cast %118 : vector<16xf32> to vector<16x1xf32>
    %120 = tpu.reciprocal %119 {approx = true} : vector<16x1xf32> -> vector<16x1xf32>
    %121 = vector.broadcast %120 : vector<16x1xf32> to vector<16x16xf32>
    %122 = arith.mulf %117, %121 : vector<16x16xf32>
    %123 = arith.truncf %122 : vector<16x16xf32> to vector<16x16xbf16>
    %124 = arith.truncf %84 : vector<16x128xf32> to vector<16x128xbf16>
    %cst_51 = arith.constant dense<0.000000e+00> : vector<16x128xf32>
    %125 = tpu.matmul %123, %124, %cst_51 {dimension_numbers = #tpu.dot_dimension_numbers<[1], [0], [0], [1], [0, 0, 1, 1], [], []>} : vector<16x16xbf16>, vector<16x128xbf16>, vector<16x128xf32> -> vector<16x128xf32>
    %cst_52 = arith.constant 8.000000e-01 : f32
    %126 = vector.broadcast %cst_52 : f32 to vector<16x128xf32>
    %127 = arith.mulf %126, %125 : vector<16x128xf32>
    %cst_53 = arith.constant 2.000000e-01 : f32
    %128 = vector.broadcast %cst_53 : f32 to vector<16x128xf32>
    %129 = arith.mulf %128, %10 : vector<16x128xf32>
    %130 = arith.addf %127, %129 : vector<16x128xf32>
    %cst_54 = arith.constant 0.904689848 : f32
    %131 = vector.broadcast %cst_54 : f32 to vector<16x128xf32>
    %132 = arith.mulf %131, %130 : vector<16x128xf32>
    %c0_55 = arith.constant 0 : index
    %c1 = arith.constant 1 : index
    %c0_56 = arith.constant 0 : index
    %c0_57 = arith.constant 0 : index
    %133 = vector.load %arg10[%c0_55, %c1, %c0_56, %c0_57] : memref<1x5x128x128xbf16, #tpu.memory_space<vmem>>, vector<1x1x128x128xbf16>
    %134 = vector.shape_cast %133 : vector<1x1x128x128xbf16> to vector<128x128xbf16>
    %135 = arith.truncf %130 : vector<16x128xf32> to vector<16x128xbf16>
    %cst_58 = arith.constant dense<0.000000e+00> : vector<16x128xf32>
    %136 = tpu.matmul %135, %134, %cst_58 {dimension_numbers = #tpu.dot_dimension_numbers<[1], [0], [0], [1], [0, 0, 1, 1], [], []>} : vector<16x128xbf16>, vector<128x128xbf16>, vector<16x128xf32> -> vector<16x128xf32>
    %cst_59 = arith.constant 0.0953101813 : f32
    %137 = vector.broadcast %cst_59 : f32 to vector<16x128xf32>
    %138 = arith.mulf %137, %136 : vector<16x128xf32>
    %139 = arith.addf %132, %138 : vector<16x128xf32>
    %cst_60 = arith.constant 0.000000e+00 : f32
    %140 = vector.broadcast %cst_60 : f32 to vector<16x128xf32>
    %141 = arith.maximumf %139, %140 : vector<16x128xf32>
    %142 = vector.extract_strided_slice %27 {offsets = [2, 0], sizes = [1, 1], strides = [1, 1]} : vector<5x2xf32> to vector<1x1xf32>
    %143 = vector.extract_strided_slice %21 {offsets = [0, 0, 0], sizes = [1, 16, 16], strides = [1, 1, 1]} : vector<2x16x16xf32> to vector<1x16x16xf32>
    %144 = vector.shape_cast %143 : vector<1x16x16xf32> to vector<16x16xf32>
    %145 = vector.broadcast %142 : vector<1x1xf32> to vector<16x16xf32>
    %146 = arith.mulf %145, %144 : vector<16x16xf32>
    %147 = vector.extract_strided_slice %27 {offsets = [2, 1], sizes = [1, 1], strides = [1, 1]} : vector<5x2xf32> to vector<1x1xf32>
    %148 = vector.extract_strided_slice %21 {offsets = [1, 0, 0], sizes = [1, 16, 16], strides = [1, 1, 1]} : vector<2x16x16xf32> to vector<1x16x16xf32>
    %149 = vector.shape_cast %148 : vector<1x16x16xf32> to vector<16x16xf32>
    %150 = vector.broadcast %147 : vector<1x1xf32> to vector<16x16xf32>
    %151 = arith.mulf %150, %149 : vector<16x16xf32>
    %152 = arith.addf %146, %151 : vector<16x16xf32>
    %153 = vector.extract_strided_slice %23 {offsets = [2, 0], sizes = [1, 128], strides = [1, 1]} : vector<5x128xf32> to vector<1x128xf32>
    %154 = vector.broadcast %153 : vector<1x128xf32> to vector<16x128xf32>
    %155 = arith.mulf %141, %154 : vector<16x128xf32>
    %cst_61 = arith.constant dense<0.000000e+00> : vector<16xf32>
    %156 = vector.multi_reduction <add>, %155, %cst_61 [1] : vector<16x128xf32> to vector<16xf32>
    %157 = vector.shape_cast %156 : vector<16xf32> to vector<16x1xf32>
    %158 = vector.extract_strided_slice %25 {offsets = [2, 0], sizes = [1, 128], strides = [1, 1]} : vector<5x128xf32> to vector<1x128xf32>
    "tpu.trace_start"() <{level = 10 : i32, message = "od,nd->on"}> : () -> ()
    %cst_62 = arith.constant dense<0.000000e+00> : vector<1x16xf32>
    %159 = tpu.matmul %158, %141, %cst_62 {dimension_numbers = #tpu.dot_dimension_numbers<[1], [1], [0], [0], [0, 0, 1, 0], [], []>} : vector<1x128xf32>, vector<16x128xf32>, vector<1x16xf32> -> vector<1x16xf32>
    "tpu.trace_stop"() : () -> ()
    %160 = vector.broadcast %157 : vector<16x1xf32> to vector<16x16xf32>
    %161 = vector.broadcast %159 : vector<1x16xf32> to vector<16x16xf32>
    %162 = arith.addf %160, %161 : vector<16x16xf32>
    %163 = arith.addf %162, %152 : vector<16x16xf32>
    %cst_63 = arith.constant 0.000000e+00 : f32
    %164 = vector.broadcast %cst_63 : f32 to vector<16x16xf32>
    %165 = arith.cmpf oge, %163, %164 : vector<16x16xf32>
    %cst_64 = arith.constant 2.000000e-01 : f32
    %166 = vector.broadcast %cst_64 : f32 to vector<16x16xf32>
    %167 = arith.mulf %166, %163 : vector<16x16xf32>
    %168 = arith.select %165, %163, %167 : vector<16x16xi1>, vector<16x16xf32>
    %169 = arith.addf %168, %18 : vector<16x16xf32>
    %cst_65 = arith.constant dense<0xFF800000> : vector<16xf32>
    %170 = vector.multi_reduction <maximumf>, %169, %cst_65 [1] : vector<16x16xf32> to vector<16xf32>
    %171 = vector.shape_cast %170 : vector<16xf32> to vector<16x1xf32>
    %172 = vector.broadcast %171 : vector<16x1xf32> to vector<16x16xf32>
    %173 = arith.subf %169, %172 : vector<16x16xf32>
    %174 = math.exp %173 : vector<16x16xf32>
    %cst_66 = arith.constant dense<0.000000e+00> : vector<16xf32>
    %175 = vector.multi_reduction <add>, %174, %cst_66 [1] : vector<16x16xf32> to vector<16xf32>
    %176 = vector.shape_cast %175 : vector<16xf32> to vector<16x1xf32>
    %177 = tpu.reciprocal %176 {approx = true} : vector<16x1xf32> -> vector<16x1xf32>
    %178 = vector.broadcast %177 : vector<16x1xf32> to vector<16x16xf32>
    %179 = arith.mulf %174, %178 : vector<16x16xf32>
    %180 = arith.truncf %179 : vector<16x16xf32> to vector<16x16xbf16>
    %181 = arith.truncf %141 : vector<16x128xf32> to vector<16x128xbf16>
    %cst_67 = arith.constant dense<0.000000e+00> : vector<16x128xf32>
    %182 = tpu.matmul %180, %181, %cst_67 {dimension_numbers = #tpu.dot_dimension_numbers<[1], [0], [0], [1], [0, 0, 1, 1], [], []>} : vector<16x16xbf16>, vector<16x128xbf16>, vector<16x128xf32> -> vector<16x128xf32>
    %cst_68 = arith.constant 8.000000e-01 : f32
    %183 = vector.broadcast %cst_68 : f32 to vector<16x128xf32>
    %184 = arith.mulf %183, %182 : vector<16x128xf32>
    %cst_69 = arith.constant 2.000000e-01 : f32
    %185 = vector.broadcast %cst_69 : f32 to vector<16x128xf32>
    %186 = arith.mulf %185, %10 : vector<16x128xf32>
    %187 = arith.addf %184, %186 : vector<16x128xf32>
    %cst_70 = arith.constant 0.935461461 : f32
    %188 = vector.broadcast %cst_70 : f32 to vector<16x128xf32>
    %189 = arith.mulf %188, %187 : vector<16x128xf32>
    %c0_71 = arith.constant 0 : index
    %c2 = arith.constant 2 : index
    %c0_72 = arith.constant 0 : index
    %c0_73 = arith.constant 0 : index
    %190 = vector.load %arg10[%c0_71, %c2, %c0_72, %c0_73] : memref<1x5x128x128xbf16, #tpu.memory_space<vmem>>, vector<1x1x128x128xbf16>
    %191 = vector.shape_cast %190 : vector<1x1x128x128xbf16> to vector<128x128xbf16>
    %192 = arith.truncf %187 : vector<16x128xf32> to vector<16x128xbf16>
    %cst_74 = arith.constant dense<0.000000e+00> : vector<16x128xf32>
    %193 = tpu.matmul %192, %191, %cst_74 {dimension_numbers = #tpu.dot_dimension_numbers<[1], [0], [0], [1], [0, 0, 1, 1], [], []>} : vector<16x128xbf16>, vector<128x128xbf16>, vector<16x128xf32> -> vector<16x128xf32>
    %cst_75 = arith.constant 0.0645385236 : f32
    %194 = vector.broadcast %cst_75 : f32 to vector<16x128xf32>
    %195 = arith.mulf %194, %193 : vector<16x128xf32>
    %196 = arith.addf %189, %195 : vector<16x128xf32>
    %cst_76 = arith.constant 0.000000e+00 : f32
    %197 = vector.broadcast %cst_76 : f32 to vector<16x128xf32>
    %198 = arith.maximumf %196, %197 : vector<16x128xf32>
    %199 = vector.extract_strided_slice %27 {offsets = [3, 0], sizes = [1, 1], strides = [1, 1]} : vector<5x2xf32> to vector<1x1xf32>
    %200 = vector.extract_strided_slice %21 {offsets = [0, 0, 0], sizes = [1, 16, 16], strides = [1, 1, 1]} : vector<2x16x16xf32> to vector<1x16x16xf32>
    %201 = vector.shape_cast %200 : vector<1x16x16xf32> to vector<16x16xf32>
    %202 = vector.broadcast %199 : vector<1x1xf32> to vector<16x16xf32>
    %203 = arith.mulf %202, %201 : vector<16x16xf32>
    %204 = vector.extract_strided_slice %27 {offsets = [3, 1], sizes = [1, 1], strides = [1, 1]} : vector<5x2xf32> to vector<1x1xf32>
    %205 = vector.extract_strided_slice %21 {offsets = [1, 0, 0], sizes = [1, 16, 16], strides = [1, 1, 1]} : vector<2x16x16xf32> to vector<1x16x16xf32>
    %206 = vector.shape_cast %205 : vector<1x16x16xf32> to vector<16x16xf32>
    %207 = vector.broadcast %204 : vector<1x1xf32> to vector<16x16xf32>
    %208 = arith.mulf %207, %206 : vector<16x16xf32>
    %209 = arith.addf %203, %208 : vector<16x16xf32>
    %210 = vector.extract_strided_slice %23 {offsets = [3, 0], sizes = [1, 128], strides = [1, 1]} : vector<5x128xf32> to vector<1x128xf32>
    %211 = vector.broadcast %210 : vector<1x128xf32> to vector<16x128xf32>
    %212 = arith.mulf %198, %211 : vector<16x128xf32>
    %cst_77 = arith.constant dense<0.000000e+00> : vector<16xf32>
    %213 = vector.multi_reduction <add>, %212, %cst_77 [1] : vector<16x128xf32> to vector<16xf32>
    %214 = vector.shape_cast %213 : vector<16xf32> to vector<16x1xf32>
    %215 = vector.extract_strided_slice %25 {offsets = [3, 0], sizes = [1, 128], strides = [1, 1]} : vector<5x128xf32> to vector<1x128xf32>
    "tpu.trace_start"() <{level = 10 : i32, message = "od,nd->on"}> : () -> ()
    %cst_78 = arith.constant dense<0.000000e+00> : vector<1x16xf32>
    %216 = tpu.matmul %215, %198, %cst_78 {dimension_numbers = #tpu.dot_dimension_numbers<[1], [1], [0], [0], [0, 0, 1, 0], [], []>} : vector<1x128xf32>, vector<16x128xf32>, vector<1x16xf32> -> vector<1x16xf32>
    "tpu.trace_stop"() : () -> ()
    %217 = vector.broadcast %214 : vector<16x1xf32> to vector<16x16xf32>
    %218 = vector.broadcast %216 : vector<1x16xf32> to vector<16x16xf32>
    %219 = arith.addf %217, %218 : vector<16x16xf32>
    %220 = arith.addf %219, %209 : vector<16x16xf32>
    %cst_79 = arith.constant 0.000000e+00 : f32
    %221 = vector.broadcast %cst_79 : f32 to vector<16x16xf32>
    %222 = arith.cmpf oge, %220, %221 : vector<16x16xf32>
    %cst_80 = arith.constant 2.000000e-01 : f32
    %223 = vector.broadcast %cst_80 : f32 to vector<16x16xf32>
    %224 = arith.mulf %223, %220 : vector<16x16xf32>
    %225 = arith.select %222, %220, %224 : vector<16x16xi1>, vector<16x16xf32>
    %226 = arith.addf %225, %18 : vector<16x16xf32>
    %cst_81 = arith.constant dense<0xFF800000> : vector<16xf32>
    %227 = vector.multi_reduction <maximumf>, %226, %cst_81 [1] : vector<16x16xf32> to vector<16xf32>
    %228 = vector.shape_cast %227 : vector<16xf32> to vector<16x1xf32>
    %229 = vector.broadcast %228 : vector<16x1xf32> to vector<16x16xf32>
    %230 = arith.subf %226, %229 : vector<16x16xf32>
    %231 = math.exp %230 : vector<16x16xf32>
    %cst_82 = arith.constant dense<0.000000e+00> : vector<16xf32>
    %232 = vector.multi_reduction <add>, %231, %cst_82 [1] : vector<16x16xf32> to vector<16xf32>
    %233 = vector.shape_cast %232 : vector<16xf32> to vector<16x1xf32>
    %234 = tpu.reciprocal %233 {approx = true} : vector<16x1xf32> -> vector<16x1xf32>
    %235 = vector.broadcast %234 : vector<16x1xf32> to vector<16x16xf32>
    %236 = arith.mulf %231, %235 : vector<16x16xf32>
    %237 = arith.truncf %236 : vector<16x16xf32> to vector<16x16xbf16>
    %238 = arith.truncf %198 : vector<16x128xf32> to vector<16x128xbf16>
    %cst_83 = arith.constant dense<0.000000e+00> : vector<16x128xf32>
    %239 = tpu.matmul %237, %238, %cst_83 {dimension_numbers = #tpu.dot_dimension_numbers<[1], [0], [0], [1], [0, 0, 1, 1], [], []>} : vector<16x16xbf16>, vector<16x128xbf16>, vector<16x128xf32> -> vector<16x128xf32>
    %cst_84 = arith.constant 8.000000e-01 : f32
    %240 = vector.broadcast %cst_84 : f32 to vector<16x128xf32>
    %241 = arith.mulf %240, %239 : vector<16x128xf32>
    %cst_85 = arith.constant 2.000000e-01 : f32
    %242 = vector.broadcast %cst_85 : f32 to vector<16x128xf32>
    %243 = arith.mulf %242, %10 : vector<16x128xf32>
    %244 = arith.addf %241, %243 : vector<16x128xf32>
    %cst_86 = arith.constant 0.951209843 : f32
    %245 = vector.broadcast %cst_86 : f32 to vector<16x128xf32>
    %246 = arith.mulf %245, %244 : vector<16x128xf32>
    %c0_87 = arith.constant 0 : index
    %c3 = arith.constant 3 : index
    %c0_88 = arith.constant 0 : index
    %c0_89 = arith.constant 0 : index
    %247 = vector.load %arg10[%c0_87, %c3, %c0_88, %c0_89] : memref<1x5x128x128xbf16, #tpu.memory_space<vmem>>, vector<1x1x128x128xbf16>
    %248 = vector.shape_cast %247 : vector<1x1x128x128xbf16> to vector<128x128xbf16>
    %249 = arith.truncf %244 : vector<16x128xf32> to vector<16x128xbf16>
    %cst_90 = arith.constant dense<0.000000e+00> : vector<16x128xf32>
    %250 = tpu.matmul %249, %248, %cst_90 {dimension_numbers = #tpu.dot_dimension_numbers<[1], [0], [0], [1], [0, 0, 1, 1], [], []>} : vector<16x128xbf16>, vector<128x128xbf16>, vector<16x128xf32> -> vector<16x128xf32>
    %cst_91 = arith.constant 0.0487901643 : f32
    %251 = vector.broadcast %cst_91 : f32 to vector<16x128xf32>
    %252 = arith.mulf %251, %250 : vector<16x128xf32>
    %253 = arith.addf %246, %252 : vector<16x128xf32>
    %cst_92 = arith.constant 0.000000e+00 : f32
    %254 = vector.broadcast %cst_92 : f32 to vector<16x128xf32>
    %255 = arith.maximumf %253, %254 : vector<16x128xf32>
    %256 = vector.extract_strided_slice %27 {offsets = [4, 0], sizes = [1, 1], strides = [1, 1]} : vector<5x2xf32> to vector<1x1xf32>
    %257 = vector.extract_strided_slice %21 {offsets = [0, 0, 0], sizes = [1, 16, 16], strides = [1, 1, 1]} : vector<2x16x16xf32> to vector<1x16x16xf32>
    %258 = vector.shape_cast %257 : vector<1x16x16xf32> to vector<16x16xf32>
    %259 = vector.broadcast %256 : vector<1x1xf32> to vector<16x16xf32>
    %260 = arith.mulf %259, %258 : vector<16x16xf32>
    %261 = vector.extract_strided_slice %27 {offsets = [4, 1], sizes = [1, 1], strides = [1, 1]} : vector<5x2xf32> to vector<1x1xf32>
    %262 = vector.extract_strided_slice %21 {offsets = [1, 0, 0], sizes = [1, 16, 16], strides = [1, 1, 1]} : vector<2x16x16xf32> to vector<1x16x16xf32>
    %263 = vector.shape_cast %262 : vector<1x16x16xf32> to vector<16x16xf32>
    %264 = vector.broadcast %261 : vector<1x1xf32> to vector<16x16xf32>
    %265 = arith.mulf %264, %263 : vector<16x16xf32>
    %266 = arith.addf %260, %265 : vector<16x16xf32>
    %267 = vector.extract_strided_slice %23 {offsets = [4, 0], sizes = [1, 128], strides = [1, 1]} : vector<5x128xf32> to vector<1x128xf32>
    %268 = vector.broadcast %267 : vector<1x128xf32> to vector<16x128xf32>
    %269 = arith.mulf %255, %268 : vector<16x128xf32>
    %cst_93 = arith.constant dense<0.000000e+00> : vector<16xf32>
    %270 = vector.multi_reduction <add>, %269, %cst_93 [1] : vector<16x128xf32> to vector<16xf32>
    %271 = vector.shape_cast %270 : vector<16xf32> to vector<16x1xf32>
    %272 = vector.extract_strided_slice %25 {offsets = [4, 0], sizes = [1, 128], strides = [1, 1]} : vector<5x128xf32> to vector<1x128xf32>
    "tpu.trace_start"() <{level = 10 : i32, message = "od,nd->on"}> : () -> ()
    %cst_94 = arith.constant dense<0.000000e+00> : vector<1x16xf32>
    %273 = tpu.matmul %272, %255, %cst_94 {dimension_numbers = #tpu.dot_dimension_numbers<[1], [1], [0], [0], [0, 0, 1, 0], [], []>} : vector<1x128xf32>, vector<16x128xf32>, vector<1x16xf32> -> vector<1x16xf32>
    "tpu.trace_stop"() : () -> ()
    %274 = vector.broadcast %271 : vector<16x1xf32> to vector<16x16xf32>
    %275 = vector.broadcast %273 : vector<1x16xf32> to vector<16x16xf32>
    %276 = arith.addf %274, %275 : vector<16x16xf32>
    %277 = arith.addf %276, %266 : vector<16x16xf32>
    %cst_95 = arith.constant 0.000000e+00 : f32
    %278 = vector.broadcast %cst_95 : f32 to vector<16x16xf32>
    %279 = arith.cmpf oge, %277, %278 : vector<16x16xf32>
    %cst_96 = arith.constant 2.000000e-01 : f32
    %280 = vector.broadcast %cst_96 : f32 to vector<16x16xf32>
    %281 = arith.mulf %280, %277 : vector<16x16xf32>
    %282 = arith.select %279, %277, %281 : vector<16x16xi1>, vector<16x16xf32>
    %283 = arith.addf %282, %18 : vector<16x16xf32>
    %cst_97 = arith.constant dense<0xFF800000> : vector<16xf32>
    %284 = vector.multi_reduction <maximumf>, %283, %cst_97 [1] : vector<16x16xf32> to vector<16xf32>
    %285 = vector.shape_cast %284 : vector<16xf32> to vector<16x1xf32>
    %286 = vector.broadcast %285 : vector<16x1xf32> to vector<16x16xf32>
    %287 = arith.subf %283, %286 : vector<16x16xf32>
    %288 = math.exp %287 : vector<16x16xf32>
    %cst_98 = arith.constant dense<0.000000e+00> : vector<16xf32>
    %289 = vector.multi_reduction <add>, %288, %cst_98 [1] : vector<16x16xf32> to vector<16xf32>
    %290 = vector.shape_cast %289 : vector<16xf32> to vector<16x1xf32>
    %291 = tpu.reciprocal %290 {approx = true} : vector<16x1xf32> -> vector<16x1xf32>
    %292 = vector.broadcast %291 : vector<16x1xf32> to vector<16x16xf32>
    %293 = arith.mulf %288, %292 : vector<16x16xf32>
    %294 = arith.truncf %293 : vector<16x16xf32> to vector<16x16xbf16>
    %295 = arith.truncf %255 : vector<16x128xf32> to vector<16x128xbf16>
    %cst_99 = arith.constant dense<0.000000e+00> : vector<16x128xf32>
    %296 = tpu.matmul %294, %295, %cst_99 {dimension_numbers = #tpu.dot_dimension_numbers<[1], [0], [0], [1], [0, 0, 1, 1], [], []>} : vector<16x16xbf16>, vector<16x128xbf16>, vector<16x128xf32> -> vector<16x128xf32>
    %cst_100 = arith.constant 8.000000e-01 : f32
    %297 = vector.broadcast %cst_100 : f32 to vector<16x128xf32>
    %298 = arith.mulf %297, %296 : vector<16x128xf32>
    %cst_101 = arith.constant 2.000000e-01 : f32
    %299 = vector.broadcast %cst_101 : f32 to vector<16x128xf32>
    %300 = arith.mulf %299, %10 : vector<16x128xf32>
    %301 = arith.addf %298, %300 : vector<16x128xf32>
    %cst_102 = arith.constant 0.960779309 : f32
    %302 = vector.broadcast %cst_102 : f32 to vector<16x128xf32>
    %303 = arith.mulf %302, %301 : vector<16x128xf32>
    %c0_103 = arith.constant 0 : index
    %c4 = arith.constant 4 : index
    %c0_104 = arith.constant 0 : index
    %c0_105 = arith.constant 0 : index
    %304 = vector.load %arg10[%c0_103, %c4, %c0_104, %c0_105] : memref<1x5x128x128xbf16, #tpu.memory_space<vmem>>, vector<1x1x128x128xbf16>
    %305 = vector.shape_cast %304 : vector<1x1x128x128xbf16> to vector<128x128xbf16>
    %306 = arith.truncf %301 : vector<16x128xf32> to vector<16x128xbf16>
    %cst_106 = arith.constant dense<0.000000e+00> : vector<16x128xf32>
    %307 = tpu.matmul %306, %305, %cst_106 {dimension_numbers = #tpu.dot_dimension_numbers<[1], [0], [0], [1], [0, 0, 1, 1], [], []>} : vector<16x128xbf16>, vector<128x128xbf16>, vector<16x128xf32> -> vector<16x128xf32>
    %cst_107 = arith.constant 0.0392207131 : f32
    %308 = vector.broadcast %cst_107 : f32 to vector<16x128xf32>
    %309 = arith.mulf %308, %307 : vector<16x128xf32>
    %310 = arith.addf %303, %309 : vector<16x128xf32>
    %cst_108 = arith.constant 0.000000e+00 : f32
    %311 = vector.broadcast %cst_108 : f32 to vector<16x128xf32>
    %312 = arith.maximumf %310, %311 : vector<16x128xf32>
    %c0_109 = arith.constant 0 : index
    %c0_110 = arith.constant 0 : index
    %c0_111 = arith.constant 0 : index
    %313 = vector.load %arg4[%c0_109, %c0_110, %c0_111] : memref<1x2x16xf32, #tpu.memory_space<vmem>>, vector<1x2x16xf32>
    %314 = vector.shape_cast %313 : vector<1x2x16xf32> to vector<2x16xf32>
    %cst_112 = arith.constant dense<0.000000e+00> : vector<2xf32>
    %315 = vector.multi_reduction <add>, %314, %cst_112 [1] : vector<2x16xf32> to vector<2xf32>
    %316 = vector.shape_cast %315 : vector<2xf32> to vector<2x1xf32>
    %317 = arith.truncf %314 : vector<2x16xf32> to vector<2x16xbf16>
    %318 = arith.truncf %312 : vector<16x128xf32> to vector<16x128xbf16>
    %cst_113 = arith.constant dense<0.000000e+00> : vector<2x128xf32>
    %319 = tpu.matmul %317, %318, %cst_113 {dimension_numbers = #tpu.dot_dimension_numbers<[1], [0], [0], [1], [0, 0, 1, 1], [], []>} : vector<2x16xbf16>, vector<16x128xbf16>, vector<2x128xf32> -> vector<2x128xf32>
    %320 = vector.broadcast %316 : vector<2x1xf32> to vector<2x128xf32>
    %321 = arith.divf %319, %320 : vector<2x128xf32>
    %c0_114 = arith.constant 0 : index
    %c0_115 = arith.constant 0 : index
    %c0_116 = arith.constant 0 : index
    %322 = vector.load %arg11[%c0_114, %c0_115, %c0_116] : memref<1x128x128xbf16, #tpu.memory_space<vmem>>, vector<1x128x128xbf16>
    %323 = vector.shape_cast %322 : vector<1x128x128xbf16> to vector<128x128xbf16>
    %324 = arith.truncf %321 : vector<2x128xf32> to vector<2x128xbf16>
    %cst_117 = arith.constant dense<0.000000e+00> : vector<2x128xf32>
    %325 = tpu.matmul %324, %323, %cst_117 {dimension_numbers = #tpu.dot_dimension_numbers<[1], [0], [0], [1], [0, 0, 1, 1], [], []>} : vector<2x128xbf16>, vector<128x128xbf16>, vector<2x128xf32> -> vector<2x128xf32>
    %326 = math.tanh %325 : vector<2x128xf32>
    %327 = arith.truncf %326 : vector<2x128xf32> to vector<2x128xbf16>
    %328 = arith.truncf %312 : vector<16x128xf32> to vector<16x128xbf16>
    "tpu.trace_start"() <{level = 10 : i32, message = "gd,nd->gn"}> : () -> ()
    %cst_118 = arith.constant dense<0.000000e+00> : vector<2x16xf32>
    %329 = tpu.matmul %327, %328, %cst_118 {dimension_numbers = #tpu.dot_dimension_numbers<[1], [1], [0], [0], [0, 0, 1, 0], [], []>} : vector<2x128xbf16>, vector<16x128xbf16>, vector<2x16xf32> -> vector<2x16xf32>
    "tpu.trace_stop"() : () -> ()
    %330 = arith.negf %329 : vector<2x16xf32>
    %331 = math.exp %330 : vector<2x16xf32>
    %cst_119 = arith.constant 1.000000e+00 : f32
    %332 = vector.broadcast %cst_119 : f32 to vector<2x16xf32>
    %333 = arith.addf %332, %331 : vector<2x16xf32>
    %334 = arith.divf %332, %333 : vector<2x16xf32>
    %335 = arith.mulf %314, %334 : vector<2x16xf32>
    %336 = arith.truncf %335 : vector<2x16xf32> to vector<2x16xbf16>
    %337 = arith.truncf %312 : vector<16x128xf32> to vector<16x128xbf16>
    %cst_120 = arith.constant dense<0.000000e+00> : vector<2x128xf32>
    %338 = tpu.matmul %336, %337, %cst_120 {dimension_numbers = #tpu.dot_dimension_numbers<[1], [0], [0], [1], [0, 0, 1, 1], [], []>} : vector<2x16xbf16>, vector<16x128xbf16>, vector<2x128xf32> -> vector<2x128xf32>
    %c0_121 = arith.constant 0 : index
    %c0_122 = arith.constant 0 : index
    %c0_123 = arith.constant 0 : index
    %339 = vector.load %arg12[%c0_121, %c0_122, %c0_123] : memref<1x2x128xf32, #tpu.memory_space<vmem>>, vector<1x2x128xf32>
    %340 = vector.shape_cast %339 : vector<1x2x128xf32> to vector<2x128xf32>
    %341 = vector.shape_cast %338 : vector<2x128xf32> to vector<1x2x128xf32>
    tpu.vector_store %arg12[%c0_121, %c0_122, %c0_123], %341 {strides = array<i32>} : memref<1x2x128xf32, #tpu.memory_space<vmem>>, vector<1x2x128xf32>,
    return
  }
  func.func @transform_0(%arg0: i32) -> (i32, i32, i32) {
    %c0_i32 = arith.constant 0 : i32
    %c0_i32_0 = arith.constant 0 : i32
    %c0_i32_1 = arith.constant 0 : i32
    return %arg0, %c0_i32, %c0_i32_0 : i32, i32, i32
  }
  func.func @transform_1(%arg0: i32) -> (i32, i32, i32) {
    %c0_i32 = arith.constant 0 : i32
    %c0_i32_0 = arith.constant 0 : i32
    %c0_i32_1 = arith.constant 0 : i32
    return %arg0, %c0_i32, %c0_i32_0 : i32, i32, i32
  }
  func.func @transform_2(%arg0: i32) -> (i32, i32, i32, i32) {
    %c0_i32 = arith.constant 0 : i32
    %c0_i32_0 = arith.constant 0 : i32
    %c0_i32_1 = arith.constant 0 : i32
    %c0_i32_2 = arith.constant 0 : i32
    return %arg0, %c0_i32, %c0_i32_0, %c0_i32_1 : i32, i32, i32, i32
  }
  func.func @transform_3(%arg0: i32) -> (i32, i32, i32) {
    %c0_i32 = arith.constant 0 : i32
    %c0_i32_0 = arith.constant 0 : i32
    %c0_i32_1 = arith.constant 0 : i32
    return %arg0, %c0_i32, %c0_i32_0 : i32, i32, i32
  }
  func.func @transform_4(%arg0: i32) -> (i32, i32, i32) {
    %c0_i32 = arith.constant 0 : i32
    %c0_i32_0 = arith.constant 0 : i32
    %c0_i32_1 = arith.constant 0 : i32
    return %arg0, %c0_i32, %c0_i32_0 : i32, i32, i32
  }
  func.func @transform_5(%arg0: i32) -> (i32, i32, i32) {
    %c0_i32 = arith.constant 0 : i32
    %c0_i32_0 = arith.constant 0 : i32
    %c0_i32_1 = arith.constant 0 : i32
    return %arg0, %c0_i32, %c0_i32_0 : i32, i32, i32
  }
  func.func @transform_6(%arg0: i32) -> (i32, i32, i32) {
    %c0_i32 = arith.constant 0 : i32
    %c0_i32_0 = arith.constant 0 : i32
    %c0_i32_1 = arith.constant 0 : i32
    return %arg0, %c0_i32, %c0_i32_0 : i32, i32, i32
  }
  func.func @transform_7(%arg0: i32) -> (i32, i32, i32) {
    %c0_i32 = arith.constant 0 : i32
    %c0_i32_0 = arith.constant 0 : i32
    %c0_i32_1 = arith.constant 0 : i32
    return %arg0, %c0_i32, %c0_i32_0 : i32, i32, i32
  }
  func.func @transform_8(%arg0: i32) -> (i32, i32, i32) {
    %c0_i32 = arith.constant 0 : i32
    %c0_i32_0 = arith.constant 0 : i32
    %c0_i32_1 = arith.constant 0 : i32
    return %arg0, %c0_i32, %c0_i32_0 : i32, i32, i32
  }
  func.func @transform_9(%arg0: i32) -> (i32, i32, i32, i32) {
    %c0_i32 = arith.constant 0 : i32
    %c0_i32_0 = arith.constant 0 : i32
    %c0_i32_1 = arith.constant 0 : i32
    %c0_i32_2 = arith.constant 0 : i32
    return %arg0, %c0_i32, %c0_i32_0, %c0_i32_1 : i32, i32, i32, i32
  }
  func.func @transform_10(%arg0: i32) -> (i32, i32, i32) {
    %c0_i32 = arith.constant 0 : i32
    %c0_i32_0 = arith.constant 0 : i32
    %c0_i32_1 = arith.constant 0 : i32
    return %arg0, %c0_i32, %c0_i32_0 : i32, i32, i32
  }
  func.func @transform_11(%arg0: i32) -> (i32, i32, i32) {
    %c0_i32 = arith.constant 0 : i32
    %c0_i32_0 = arith.constant 0 : i32
    %c0_i32_1 = arith.constant 0 : i32
    return %arg0, %c0_i32, %c0_i32_0 : i32, i32, i32
  }
}

</mosaic_0001>

<bundles_post_ra>
// kernel: tpu_custom_call.1
= control target key start
LH: loop header
LB: loop body
LE: loop exit
PB: predicated region body
PF: predicated region fallthrough
CT: control target
= control target key end

     0   :  { %s3071_s0 = inlined_call_operand.vmem [shape: f32[2,16,4], index: 0, kind: input, shape index: {}]   ;;  %s3072_s1 = inlined_call_operand.vmem [shape: bf16[2,16,16], index: 1, kind: input, shape index: {}]   ;;  %s3073_s2 = inlined_call_operand.vmem [shape: bf16[2,2,16,16], index: 2, kind: input, shape index: {}]   ;;  %s3074_s3 = inlined_call_operand.vmem [shape: f32[2,2,16], index: 3, kind: input, shape index: {}]   ;;  %s3075_s4 = inlined_call_operand.vmem [shape: f32[2,4,128], index: 4, kind: input, shape index: {}]   ;;  %s3076_s5 = inlined_call_operand.vmem [shape: f32[2,1,128], index: 5, kind: input, shape index: {}]   ;;  %s3077_s6 = inlined_call_operand.vmem [shape: f32[2,5,128], index: 6, kind: input, shape index: {}]   ;;  %s3078_s7 = inlined_call_operand.vmem [shape: f32[2,5,128], index: 7, kind: input, shape index: {}]   ;;  %s3079_s8 = inlined_call_operand.vmem [shape: f32[2,5,2], index: 8, kind: input, shape index: {}]   ;;  %s3080_s9 = inlined_call_operand.hbm [shape: bf16[2,5,128,128], index: 9, kind: input, shape index: {}]   ;;  %s3081_s10 = inlined_call_operand.hbm [shape: bf16[2,128,128], index: 10, kind: input, shape index: {}]   ;;  %s3082_s11 = inlined_call_operand.hbm [shape: f32[2,2,128], index: 11, kind: output, shape index: {}]  }
   0x1   :  { %3093 = sst [smem:[#allocation17_spill]] %s3080_s9 }
   0x2   :  { %3094 = sst [smem:[#allocation18_spill]] %s3082_s11 }
   0x3   :  { %16 = vsyncpa [#allocation3], 0 }
   0x4   :  { %18 = vsyncpa [#allocation3 + $0x1], 0 }
   0x5   :  { %19 = vsyncpa [#allocation6], 0 }
   0x6   :  { %21 = vsyncpa [#allocation6 + $0x1], 0 }
   0x7   :  { %22 = vsyncpa [#allocation4], 0 }
   0x8   :  { %24 = vsyncpa [#allocation4 + $0x1], 0  ;;  %s2685_s17 = smov 0   ;;  %s2687_s18 = smov 0  }
   0x9   :  { %s2689_s19 = smov 0   ;;  %s2691_s20 = smov 0  }
   0xa LB: > { %3095 = sst [smem:[#allocation11_spill]] %s2607_s17  ;;  %s2706_s21 = sadd.s32 4294967295, %s2619_s20   ;;  %s2619_s20 = sphi %s2691_s20, %s3113_s20   ;;  %s2615_s19 = sphi %s2689_s19, %s3115_s19   ;;  %s2611_s18 = sphi %s2687_s18, %s3117_s18   ;;  %s2607_s17 = sphi %s2685_s17, %s3116_s17  }
   0xb   : > { %3096 = sst [smem:[#allocation12_spill]] %s2615_s19  ;;  %s2005_s22 = sadd.s32 4294967294, %s2619_s20  }
   0xc   : > { %s2710_s23 = sadd.s32 1, %s2619_s20   ;;  %s271_s24 = sadd.s32 1, %s2615_s19 }
   0xd   : > { %3097 = sst [smem:[#allocation13_spill]] %s2710_s23  ;;  %s268_s25 = ssub.s32 %s2619_s20, %s2710_s23 }
   0xe   : > { %p278_p0 = scmp.ne.s32.totalorder %s2615_s19, %s2611_s18  ;;  %p269_p1 = scmp.eq.s32.totalorder %s268_s25, 0 }
   0xf   : > { %p279_p2 = scmp.eq.s32.totalorder %s2619_s20, 0  ;;  %p284_p3 = scmp.ne.s32.totalorder %s2611_s18, %s2607_s17 }
  0x10   : > { %p285_p4 = scmp.eq.s32.totalorder %s2706_s21, 0  ;;  %p334_p7 = scmp.eq.s32.totalorder %s2706_s21, 1 }
  0x11   : > { %s2722_s26 = scalar_select %p269_p1, %s2615_s19, %s271_s24  }
  0x12   : > { %p280_p5 = por %p279_p2, %p278_p0  ;;  %p2724_p6 = por %p285_p4, %p284_p3 }
  0x13   : > { %3098 = sst [smem:[#allocation14_spill]] %s2722_s26  ;;  %p340_p8 = scmp.eq.s32.totalorder %s2005_s22, 1 }
  0x14   : > { %p2007_p9 = scmp.ge.s32.totalorder %s2619_s20, 2  ;;  %p2402_p10 = scmp.lt.s32.totalorder %s2619_s20, 2 }
  0x15   : > { %p2731_p11 = por %p334_p7, %p278_p0  ;;  %p2735_p12 = por %p340_p8, %p284_p3 }
  0x16   : > { %s2740_s30 = sand.u32 1, %s2615_s19   ;;  %s2363_s12 = smul.u32 320, %s2619_s20 }
  0x17   : > { %s3100_s28 = scalar_select %p2731_p11, 1, 0 }
  0x18   : > { %s3102_s29 = scalar_select %p2735_p12, 1, 0 }
  0x19   : > { %3101 = sst [smem:[#allocation15_spill]] %s3100_s28  ;;  %s2362_s13 = smul.u32 320, %s2740_s30 }
  0x1a   : > { %3103 = sst [smem:[#allocation16_spill]] %s3102_s29  ;;  %p2747_p13 = pnand %p2402_p10, %p280_p5 }
  0x1b   : > { %s3104_s9 = sld [smem:[#allocation17_spill]]  ;;  %s429_s25 = scalar_lea.vmem [#allocation2], %s2362_s13 }
  0x1c   : > { %s437_s26 = sshll.u32 %s429_s25, 4  ;;  %s426_s19 = scalar_lea.sflag [#allocation3], %s2740_s30  ;;  %s438_s26 = int_to_ptr.vmem [resolvable:$true] %s437_s26 }
  0x1d   : > { %p2493_p1 = pneg %p2747_p13 }
  0x21   : > { %s434_s16 = scalar_lea.hbm %s3104_s9, %s2363_s12  ;;  %s2496_s15 = scalar_lea.hbm %s3104_s9, 640 }
  0x22   : > { %s435_s24 = sshll.u32 %s434_s16, 4  ;;  %s436_s24 = int_to_ptr.hbm [resolvable:$true] %s435_s24 }
  0x23   : > { %s2489_s23 = sshra.s32 %s436_s24, 4  ;;  %s2490_s23 = int_to_ptr.hbm [resolvable:$true] %s2489_s23 }
  0x24   : > { %s2491_s29 = scalar_lea.hbm %s2490_s23, 320  ;;  %p2497_p4 = scmp.lt.s32.totalorder %s2490_s23, %s3104_s9 }
  0x25   : > { %p2492_p0 = scmp.ne.s32.totalorder %s2490_s23, %s2491_s29  ;;  %p2498_p5 = scmp.lt.s32.totalorder %s2496_s15, %s2491_s29 }
  0x27   : > { %p2494_p2 = pnand %p2493_p1, %p2492_p0  ;;  %p2499_p7 = por %p2498_p5, %p2497_p4 }
  0x29   : > { %p2495_p3 = pneg %p2494_p2 }
  0x2b   : > { %p2500_p8 = pnand %p2499_p7, %p2495_p3 }
  0x2d   : > { %2503 = shalt.err (!%p2500_p8)
}
  0x2e   : > { %s3091_s13 = smov 64   ;;  %s3092_s25 = smov 4  }
  0x2f   : > { %2394 = dma.hbm_to_vmem [thread:$0]  (!%p2747_p13), %s436_s24, 5120, %s438_s26, %s426_s19, %s3091_s13, %s3091_s13, %s3092_s25  }
  0x30   : > { %p2012_p10 = scmp.ge.s32.totalorder %s2619_s20, 1  ;;  %p467_p0 = scmp.lt.s32.totalorder %s2619_s20, 3 }
  0x31   : > { %s2009_s17 = sshll.u32 %s2740_s30, 6  ;;  %s2297_s29 = sshll.u32 %s2619_s20, 6 }
  0x32   : > { %p2771_p2 = pnand %p2012_p10, %p467_p0  ;;  %s451_s12 = scalar_lea.vmem [#allocation5], %s2009_s17 }
  0x33   : > { %s459_s14 = sshll.u32 %s451_s12, 4  ;;  %s456_s9 = scalar_lea.hbm %s3081_s10, %s2297_s29  ;;  %s460_s14 = int_to_ptr.vmem [resolvable:$true] %s459_s14 }
  0x34   : > { %s457_s11 = sshll.u32 %s456_s9, 4  ;;  %s448_s28 = scalar_lea.sflag [#allocation6], %s2740_s30  ;;  %s458_s11 = int_to_ptr.hbm [resolvable:$true] %s457_s11 }
  0x35   : > { %s2519_s19 = sshra.s32 %s458_s11, 4  ;;  %s2526_s17 = scalar_lea.hbm %s3081_s10, 128  ;;  %s2520_s19 = int_to_ptr.hbm [resolvable:$true] %s2519_s19 }
  0x36   : > { %s2521_s26 = scalar_lea.hbm %s2520_s19, 64  ;;  %p2527_p7 = scmp.lt.s32.totalorder %s2520_s19, %s3081_s10 }
  0x37   : > { %p2522_p3 = scmp.ne.s32.totalorder %s2520_s19, %s2521_s26  ;;  %p2528_p8 = scmp.lt.s32.totalorder %s2526_s17, %s2521_s26 }
  0x39   : > { %p2524_p4 = pnand %p2522_p3, %p2493_p1  ;;  %p2529_p10 = por %p2528_p8, %p2527_p7 }
  0x3b   : > { %p2525_p5 = pneg %p2524_p4 }
  0x3d   : > { %p2530_p0 = pnand %p2529_p10, %p2525_p5 }
  0x3f   : > { %2533 = shalt.err (!%p2530_p0)
}
  0x40   : > { %s3107_s9 = smov 4   ;;  %s3108_s30 = smov 64  }
  0x41   : > { %2397 = dma.hbm_to_vmem [thread:$0]  (!%p2747_p13), %s458_s11, 1024, %s460_s14, %s448_s28, %s3108_s30, %s3108_s30, %s3107_s9  }
  0x42   : > { %471 = sbr.rel (%p2771_p2) target bundleno = 4243 (0x1093), region = 64  ;;  %s2797_s13 = sand.u32 (!%p2771_p2), 1, %s2611_s18  }
  0x43   : > { %s2364_s25 = smul.u32 (!%p2771_p2), 320, %s2797_s13  ;;  %s474_s29 = scalar_lea.sflag (!%p2771_p2), [#allocation3], %s2797_s13 }
  0x45   : > { %s2801_s15 = scalar_lea.vmem (!%p2771_p2), [#allocation2], %s2364_s25 }
  0x47   : > { %2594 = dma.done.wait (%p2724_p6), %s474_s29, 5120  }
  0x48   : > { %2596 = vsyncadd (%p2724_p6), %s474_s29, 4294962176  ;;  %s2013_s11 = sshll.u32 %s2797_s13, 6  ;;  %s484_s28 = scalar_lea.sflag [#allocation6], %s2797_s13 }
  0x49   : > { %s2809_s22 = scalar_lea.vmem [#allocation5], %s2013_s11 }
  0x4a   : > { %2598 = dma.done.wait (%p2724_p6), %s484_s28, 1024  }
  0x4b   : > { %2600 = vsyncadd (%p2724_p6), %s484_s28, 4294966272  ;;  %p570_p13 = scmp.lt.s32.totalorder %s2706_s21, 1  ;;  %vm623_vm0 = vcmask 1043456   ;;  %vm616_vm1 = vcmask 31744   ;;  %s2623_s19 = smov 127   ;;  %vm726_vm6 = vcmask 130048  }
  0x4c   : > { %v2624_v43 = vmov -1e+30   ;;  %vm1623_vm15 = vcmask 123904  }
  0x4d   : > { %s2817_s23 = scalar_select %p570_p13, %s2706_s21, 1 }
  0x4f   : > { %s2022_s14 = sshll.u32 %s2817_s23, 2  ;;  %s2298_s16 = sshll.u32 %s2817_s23, 4 }
  0x50   : > { %s592_s24 = scalar_lea.vmem %s3075_s4, %s2022_s14  ;;  %s574_s12 = scalar_lea.vmem %s3071_s0, %s2298_s16 }
  0x51   : > { %s2830_s9 = sshll.u32 %s2817_s23, 3  ;;  %v611_v0 = vld [vmem:[%s592_s24] sm:$0xf]  ;;  %s595_s14 = scalar_lea.vmem %s3076_s5, %s2817_s23  ;;  %v610_v3 = vld [vmem:[%s574_s12 + $0x8] sm:$0xff] }
  0x52   : > { %v609_v1 = vld [vmem:[%s574_s12] sm:$0xff]  ;;  %s607_s29 = scalar_lea.vmem %s3079_s8, %s2830_s9  ;;  %2026 = vmatpush.msk.msra.mxu0 %vm623_vm0, %v611_v0  ;;  %s599_s27 = scalar_lea.vmem %s3077_s6, %s2830_s9  ;;  %v2308_v0 = vld [vmem:[%s2801_s15 + $0x38] sm:$0xff] }
  0x53   : > { %v2836_v2 = vld [vmem:[%s607_s29] sm:$0x1f]  ;;  %2027 = vmatmul.msk.f32.vlgmr.msra.gmra.mxu0 %vm616_vm1, %v609_v1  ;;  %s603_s30 = scalar_lea.vmem %s3078_s7, %s2830_s9  ;;  %s584_s11 = scalar_lea.vmem %s3073_s2, %s2298_s16  ;;  %v2307_v1 = vld [vmem:[%s2801_s15 + $0x30] sm:$0xff] }
  0x54   : > { %677 = vrot.lane.b32.xlu0 %v2836_v2, %s2623_s19  ;;  %2365 = vpush %v2836_v2  ;;  %v2440_v5 = vld [vmem:[%s595_s14] ss:$0 sm:$0xff]  ;;  %v2361_v19 = vld [vmem:[%s584_s11 + $0x8] sm:$0xff]  }
  0x55   : > { %v2849_v6 = vld [vmem:[%s599_s27] sm:$0x1f]  ;;  %v2878_v22 = vunpack.c.l.bf16 %v2361_v19  ;;  %v2880_v23 = vunpack.c.h.bf16 %v2361_v19  ;;  %s579_s27 = scalar_lea.vmem %s3072_s1, %s2830_s9 }
  0x56   : > { %v686_v9 = vperm.slane %v2849_v6, 0  ;;  %v2866_v17 = vld [vmem:[%s603_s30] sm:$0x1f] }
  0x57   : > { %v2354_v18 = vld [vmem:[%s584_s11] sm:$0xff]   ;;  %s2021_s11 = sshll.u32 %s2817_s23, 1  ;;  %s2014_s23 = sshll.u32 %s2797_s13, 1 }
  0x58   : > { %v2874_v20 = vunpack.c.l.bf16 %v2354_v18  ;;  %v2876_v21 = vunpack.c.h.bf16 %v2354_v18  ;;  %v2350_v26 = vld [vmem:[%s579_s27] sm:$0xff]   ;;  %v2302_v18 = vld [vmem:[%s2801_s15 + $0x8] sm:$0xff]  ;;  %s588_s26 = scalar_lea.vmem %s3074_s3, %s2021_s11 }
  0x59   : > { %v2352_v31 = vunpack.c.h.bf16 %v2350_v26  ;;  %v2351_v32 = vunpack.c.l.bf16 %v2350_v26  ;;  %v2301_v19 = vld [vmem:[%s2801_s15] sm:$0xff] }
  0x5b   : > { %2028 = vmatmul.msk.f32.gmra.mxu0 %vm616_vm1, %v610_v3  ;;  %vm657_vm2 = vcmp.gt.f32.partialorder %v2352_v31, 0.0  ;;  %vm656_vm3 = vcmp.gt.f32.partialorder %v2351_v32, 0.0  ;;  %v2306_v3 = vld [vmem:[%s2801_s15 + $0x28] sm:$0xff] }
  0x5c   : > { %v2890_v44 = vsel %vm657_vm2, 0.0, %v2624_v43  ;;  %v2892_v45 = vsel %vm656_vm3, 0.0, %v2624_v43 }
  0x85   : > { %s2366_s28 = spop %2365 }
  0x86   : > { %v673_v24 = vstv %s2366_s28 }
  0x87   : > { %v675_v27 = vmul.f32 %v2874_v20, %v673_v24  ;;  %v676_v28 = vmul.f32 %v2876_v21, %v673_v24 }
  0xc6   : > { %v678_v4 = vpop.permute.xlu0 %677 }
  0xc7   : > { %2367 = vpush %v678_v4  ;;  %v2305_v4 = vld [vmem:[%s2801_s15 + $0x20] sm:$0xff] }
  0xd0   : > { %v644_v7 = vpop.f32.mrf.mxu0 }
  0xd1   : > { %v645_v8 = vadd.f32 %v2440_v5, %v644_v7 }
  0xd3   : > { %v2852_v10 = vmax.f32 %v645_v8, 0.0 }
  0xd5   : > { %v687_v11 = vmul.f32 %v686_v9, %v2852_v10 }
  0xd7   : > { %689 = vadd.xlane.f32.xlu0 %v687_v11 }
  0xd8   : > { %v647_v12 = vpop.f32.mrf.mxu0 }
  0xd9   : > { %v648_v13 = vadd.f32 %v2440_v5, %v647_v12 }
  0xdb   : > { %v2855_v14 = vmax.f32 %v648_v13, 0.0 }
  0xdd   : > { %707 = vmatpush.xpose.msra.mxu3 %v2855_v14  ;;  %v688_v15 = vmul.f32 %v686_v9, %v2855_v14  ;;  %v750_v16 = vpack.c.bf16 %v2855_v14, %v2852_v10 }
  0xdf   : > { %691 = vadd.xlane.f32.xlu1 %v688_v15  ;;  %761 = vmatpush.bf16.msra.mxu2 %v750_v16  ;;  %v2304_v15 = vld [vmem:[%s2801_s15 + $0x18] sm:$0xff]  ;;  %v2303_v16 = vld [vmem:[%s2801_s15 + $0x10] sm:$0xff] }
  0xe1   : > { %708 = vmatpush.xpose.msra.mxu3 %v2852_v10 }
  0xe4   : > { %709 = vmatmul.f32.vlgmr.msra.gmra.mxu3 %v2866_v17 }
  0xe5   : > { %841 = vmatpush.bf16.msrb.mxu3 %v2308_v0 }
  0xe9   : > { %842 = vmatpush.bf16.msrb.mxu3 %v2307_v1 }
  0xed   : > { %843 = vmatpush.bf16.msrb.mxu3 %v2306_v3 }
  0xf1   : > { %844 = vmatpush.bf16.msrb.mxu3 %v2305_v4 }
  0xf5   : > { %845 = vmatpush.bf16.msrb.mxu3 %v2304_v15 }
  0xf8   : > { %s2368_s14 = spop %2367 }
  0xf9   : > { %v680_v25 = vstv %s2368_s14  ;;  %846 = vmatpush.bf16.msrb.mxu3 %v2303_v16 }
  0xfa   : > { %v682_v29 = vmul.f32 %v2878_v22, %v680_v25  ;;  %v683_v30 = vmul.f32 %v2880_v23, %v680_v25 }
  0xfc   : > { %v684_v34 = vadd.f32 %v682_v29, %v675_v27  ;;  %v685_v35 = vadd.f32 %v683_v30, %v676_v28  ;;  %v2910_v27 = vmul.f32 0.2, %v2852_v10  ;;  %v2913_v28 = vmul.f32 0.2, %v2855_v14 }
  0xfd   : > { %847 = vmatpush.bf16.msrb.mxu3 %v2302_v18 }
 0x101   : > { %848 = vmatpush.bf16.msrb.mxu3 %v2301_v19 }
 0x14a   : > { %v690_v37 = vpop.xlane.xlu0 %689 }
 0x152   : > { %v692_v38 = vpop.xlane.xlu1 %691 }
 0x167   : > { %v710_v33 = vpop.f32.mrf.mxu3 }
 0x168   : > { %v713_v36 = vperm.slane %v710_v33, 0  ;;  %v861_v33 = vrot.slane %v2836_v2, 1 }
 0x16a   : > { %v714_v39 = vadd.f32 %v713_v36, %v690_v37  ;;  %v715_v40 = vadd.f32 %v713_v36, %v692_v38  ;;  %2369 = vpush %v861_v33  ;;  %v876_v37 = vperm.slane %v2849_v6, 1 }
 0x16c   : > { %v716_v41 = vadd.f32 %v714_v39, %v684_v34  ;;  %v717_v42 = vadd.f32 %v715_v40, %v685_v35 }
 0x16e   : > { %vm719_vm4 = vcmp.ge.f32.partialorder %v717_v42, 0.0  ;;  %v721_v46 = vmul.f32 0.2, %v717_v42  ;;  %vm718_vm5 = vcmp.ge.f32.partialorder %v716_v41, 0.0  ;;  %v720_v47 = vmul.f32 0.2, %v716_v41 }
 0x170   : > { %v723_v48 = vsel %vm719_vm4, %v717_v42, %v721_v46  ;;  %v722_v49 = vsel %vm718_vm5, %v716_v41, %v720_v47 }
 0x171   : > { %v725_v50 = vadd.f32 %v723_v48, %v2890_v44  ;;  %v724_v51 = vadd.f32 %v722_v49, %v2892_v45  ;;  %v884_v48 = vrot.slane %v2866_v17, 1 }
 0x173   : > { %v730_v52 = vsel %vm726_vm6, %v725_v50, -inf  ;;  %v727_v53 = vsel %vm726_vm6, %v724_v51, -inf }
 0x174   : > { %731 = vmax.xlane.f32.xlu2 %v730_v52  ;;  %728 = vmax.xlane.f32.xlu1 %v727_v53 }
 0x19b   : > { %s2370_s16 = spop %2369 }
 0x1e7   : > { %v732_v54 = vpop.xlane.xlu2 %731  ;;  %v729_v55 = vpop.xlane.xlu1 %728 }
 0x1e8   : > { %v734_v56 = vsub.f32 %v725_v50, %v732_v54  ;;  %v733_v57 = vsub.f32 %v724_v51, %v729_v55  ;;  %v863_v51 = vstv %s2370_s16  ;;  %s3110_s16 = sld [smem:[#allocation18_spill]] }
 0x1e9   : > { %v865_v53 = vmul.f32 %v2874_v20, %v863_v51  ;;  %v866_v54 = vmul.f32 %v2876_v21, %v863_v51 }
 0x1ea   : > { %v737_v58 = vmul.f32 1.442695, %v734_v56  ;;  %v735_v59 = vmul.f32 1.442695, %v733_v57 }
 0x1ec   : > { %2441 = vpow2.f32 %v737_v58 }
 0x1ed   : > { %2443 = vpow2.f32 %v735_v59 }
 0x1ee   : > { %s2569_s28 = scalar_lea.hbm %s3110_s16, 4 }
 0x1f2   : > { %v2442_v60 = vpop.eup %2441 }
 0x1f3   : > { %v2444_v61 = vpop.eup %2443  ;;  %v742_v62 = vsel %vm726_vm6, %v2442_v60, 0.0 }
 0x1f4   : > { %743 = vadd.xlane.f32.xlu1 %v742_v62  ;;  %v739_v63 = vsel %vm726_vm6, %v2444_v61, 0.0 }
 0x1f5   : > { %740 = vadd.xlane.f32.xlu2 %v739_v63 }
 0x20d   : > { %867 = vrot.lane.b32.xlu2 %v861_v33, %s2623_s19  ;;  %v2314_v33 = vld [vmem:[%s2801_s15 + $0x68] sm:$0xff] }
 0x267   : > { %v744_v5 = vpop.xlane.xlu1 %743 }
 0x268   : > { %v741_v7 = vpop.xlane.xlu2 %740  ;;  %2445 = vrcp.f32 %v744_v5 }
 0x269   : > { %2447 = vrcp.f32 %v741_v7 }
 0x26e   : > { %v2446_v8 = vpop.eup %2445 }
 0x26f   : > { %v2448_v9 = vpop.eup %2447  ;;  %v748_v11 = vmul.f32 %v2446_v8, %v2442_v60 }
 0x270   : > { %v747_v12 = vmul.f32 %v2448_v9, %v2444_v61  ;;  %v868_v49 = vpop.permute.xlu2 %867 }
 0x271   : > { %2371 = vpush %v868_v49 }
 0x272   : > { %v749_v13 = vpack.c.bf16 %v748_v11, %v747_v12 }
 0x274   : > { %2029 = vmatmul.msk.bf16.vlgmr.msra.gmra.mxu2 %vm726_vm6, %v749_v13 }
 0x2a2   : > { %s2372_s9 = spop %2371 }
 0x2a3   : > { %v870_v52 = vstv %s2372_s9 }
 0x2a4   : > { %v872_v55 = vmul.f32 %v2878_v22, %v870_v52  ;;  %v873_v56 = vmul.f32 %v2880_v23, %v870_v52 }
 0x2a6   : > { %v874_v58 = vadd.f32 %v872_v55, %v865_v53  ;;  %v875_v59 = vadd.f32 %v873_v56, %v866_v54 }
 0x2f7   : > { %v763_v24 = vpop.f32.mrf.mxu2 }
 0x2f8   : > { %v768_v25 = vmul.f32 0.8, %v763_v24 }
 0x2fa   : > { %v772_v30 = vadd.f32 %v2910_v27, %v768_v25 }
 0x2fc   : > { %v774_v35 = vmul.f32 0.81767845, %v772_v30 }
 0x2ff   : > { %v765_v26 = vpop.f32.mrf.mxu2 }
 0x300   : > { %v769_v29 = vmul.f32 0.8, %v765_v26 }
 0x302   : > { %v773_v31 = vadd.f32 %v2913_v28, %v769_v29 }
 0x304   : > { %v792_v32 = vpack.c.bf16 %v773_v31, %v772_v30  ;;  %v775_v40 = vmul.f32 0.81767845, %v773_v31  ;;  %v2316_v31 = vld [vmem:[%s2801_s15 + $0x78] sm:$0xff] }
 0x305   : > { %1032 = vmatpush.bf16.msrb.mxu2 %v2316_v31 }
 0x306   : > { %849 = vmatmul.bf16.vlgmr.msrb.gmra.mxu3 %v792_v32  ;;  %v2315_v32 = vld [vmem:[%s2801_s15 + $0x70] sm:$0xff] }
 0x309   : > { %1033 = vmatpush.bf16.msrb.mxu2 %v2315_v32 }
 0x30d   : > { %1034 = vmatpush.bf16.msrb.mxu2 %v2314_v33 }
 0x389   : > { %v850_v34 = vpop.f32.mrf.mxu3 }
 0x38a   : > { %v855_v36 = vmul.f32 0.18232156, %v850_v34  ;;  %v2313_v34 = vld [vmem:[%s2801_s15 + $0x60] sm:$0xff] }
 0x38b   : > { %1035 = vmatpush.bf16.msrb.mxu2 %v2313_v34 }
 0x38c   : > { %v857_v10 = vadd.f32 %v855_v36, %v774_v35 }
 0x38e   : > { %v859_v14 = vmax.f32 %v857_v10, 0.0 }
 0x390   : > { %v877_v38 = vmul.f32 %v876_v37, %v859_v14 }
 0x391   : > { %v852_v39 = vpop.f32.mrf.mxu3 }
 0x392   : > { %v856_v41 = vmul.f32 0.18232156, %v852_v39  ;;  %879 = vadd.xlane.f32.xlu1 %v877_v38 }
 0x394   : > { %v858_v42 = vadd.f32 %v856_v41, %v775_v40  ;;  %v2312_v40 = vld [vmem:[%s2801_s15 + $0x58] sm:$0xff]  ;;  %v2311_v41 = vld [vmem:[%s2801_s15 + $0x50] sm:$0xff] }
 0x395   : > { %1036 = vmatpush.bf16.msrb.mxu2 %v2312_v40 }
 0x396   : > { %v860_v43 = vmax.f32 %v858_v42, 0.0  ;;  %v2310_v42 = vld [vmem:[%s2801_s15 + $0x48] sm:$0xff] }
 0x398   : > { %900 = vmatpush.xpose.msra.mxu1 %v860_v43  ;;  %v942_v46 = vpack.c.bf16 %v860_v43, %v859_v14  ;;  %v878_v47 = vmul.f32 %v876_v37, %v860_v43  ;;  %v2309_v43 = vld [vmem:[%s2801_s15 + $0x40] sm:$0xff] }
 0x399   : > { %1037 = vmatpush.bf16.msrb.mxu2 %v2311_v41 }
 0x39a   : > { %953 = vmatpush.bf16.msrb.mxu0 %v942_v46  ;;  %881 = vadd.xlane.f32.xlu1 %v878_v47  ;;  %v1052_v46 = vrot.slane %v2836_v2, 2 }
 0x39c   : > { %901 = vmatpush.xpose.msra.mxu1 %v859_v14  ;;  %2373 = vpush %v1052_v46 }
 0x39d   : > { %1038 = vmatpush.bf16.msrb.mxu2 %v2310_v42 }
 0x39f   : > { %902 = vmatmul.f32.vlgmr.msra.gmra.mxu1 %v884_v48 }
 0x3a1   : > { %1039 = vmatpush.bf16.msrb.mxu2 %v2309_v43 }
 0x3cd   : > { %s2374_s17 = spop %2373 }
 0x405   : > { %v880_v50 = vpop.xlane.xlu1 %879 }
 0x40d   : > { %v882_v61 = vpop.xlane.xlu1 %881 }
 0x41c   : > { %v903_v57 = vpop.f32.mrf.mxu1 }
 0x41d   : > { %v906_v60 = vperm.slane %v903_v57, 0 }
 0x41f   : > { %v907_v62 = vadd.f32 %v906_v60, %v880_v50  ;;  %v908_v63 = vadd.f32 %v906_v60, %v882_v61 }
 0x421   : > { %v909_v0 = vadd.f32 %v907_v62, %v874_v58  ;;  %v910_v1 = vadd.f32 %v908_v63, %v875_v59  ;;  %v1067_v59 = vperm.slane %v2849_v6, 2 }
 0x423   : > { %vm911_vm7 = vcmp.ge.f32.partialorder %v909_v0, 0.0  ;;  %v913_v3 = vmul.f32 0.2, %v909_v0  ;;  %vm912_vm8 = vcmp.ge.f32.partialorder %v910_v1, 0.0  ;;  %v914_v4 = vmul.f32 0.2, %v910_v1 }
 0x425   : > { %v915_v5 = vsel %vm911_vm7, %v909_v0, %v913_v3  ;;  %v916_v7 = vsel %vm912_vm8, %v910_v1, %v914_v4 }
 0x426   : > { %v917_v8 = vadd.f32 %v915_v5, %v2892_v45  ;;  %v918_v9 = vadd.f32 %v916_v7, %v2890_v44  ;;  %v1074_v7 = vrot.slane %v2866_v17, 2 }
 0x428   : > { %v919_v11 = vsel %vm726_vm6, %v917_v8, -inf  ;;  %v922_v12 = vsel %vm726_vm6, %v918_v9, -inf }
 0x429   : > { %920 = vmax.xlane.f32.xlu1 %v919_v11  ;;  %923 = vmax.xlane.f32.xlu2 %v922_v12 }
 0x49c   : > { %v924_v13 = vpop.xlane.xlu2 %923  ;;  %v921_v15 = vpop.xlane.xlu1 %920 }
 0x49d   : > { %v926_v16 = vsub.f32 %v918_v9, %v924_v13  ;;  %v925_v18 = vsub.f32 %v917_v8, %v921_v15  ;;  %v1054_v9 = vstv %s2374_s17  ;;  %s569_s17 = scalar_lea.vmem [#allocation7], %s2014_s23 }
 0x49e   : > { %v1056_v12 = vmul.f32 %v2874_v20, %v1054_v9  ;;  %v1057_v13 = vmul.f32 %v2876_v21, %v1054_v9 }
 0x49f   : > { %v929_v19 = vmul.f32 1.442695, %v926_v16  ;;  %v927_v24 = vmul.f32 1.442695, %v925_v18 }
 0x4a1   : > { %2449 = vpow2.f32 %v929_v19 }
 0x4a2   : > { %2451 = vpow2.f32 %v927_v24 }
 0x4a7   : > { %v2450_v25 = vpop.eup %2449 }
 0x4a8   : > { %v2452_v26 = vpop.eup %2451  ;;  %v934_v29 = vsel %vm726_vm6, %v2450_v25, 0.0 }
 0x4a9   : > { %935 = vadd.xlane.f32.xlu0 %v934_v29  ;;  %v931_v30 = vsel %vm726_vm6, %v2452_v26, 0.0 }
 0x4aa   : > { %932 = vadd.xlane.f32.xlu1 %v931_v30 }
 0x4c3   : > { %1058 = vrot.lane.b32.xlu1 %v1052_v46, %s2623_s19 }
 0x51c   : > { %v936_v35 = vpop.xlane.xlu0 %935 }
 0x51d   : > { %2453 = vrcp.f32 %v936_v35  ;;  %v933_v36 = vpop.xlane.xlu1 %932 }
 0x51e   : > { %2455 = vrcp.f32 %v933_v36 }
 0x523   : > { %v2454_v10 = vpop.eup %2453 }
 0x524   : > { %v2456_v37 = vpop.eup %2455  ;;  %v940_v14 = vmul.f32 %v2454_v10, %v2450_v25 }
 0x525   : > { %v939_v38 = vmul.f32 %v2456_v37, %v2452_v26 }
 0x527   : > { %v941_v39 = vpack.c.bf16 %v940_v14, %v939_v38 }
 0x529   : > { %2062 = vmatmul.msk.bf16.vlgmr.msrb.gmra.mxu0 %vm726_vm6, %v941_v39 }
 0x535   : > { %v1059_v54 = vpop.permute.xlu1 %1058 }
 0x536   : > { %2375 = vpush %v1059_v54  ;;  %v2321_v54 = vld [vmem:[%s2801_s15 + $0xa0] sm:$0xff] }
 0x567   : > { %s2376_s12 = spop %2375 }
 0x568   : > { %v1061_v11 = vstv %s2376_s12  ;;  %s1804_s12 = sshll.u32 %s569_s17, 4  ;;  %s1805_s12 = int_to_ptr.vmem [resolvable:$true] %s1804_s12 }
 0x569   : > { %v1063_v15 = vmul.f32 %v2878_v22, %v1061_v11  ;;  %v1064_v16 = vmul.f32 %v2880_v23, %v1061_v11 }
 0x56b   : > { %v1065_v19 = vadd.f32 %v1063_v15, %v1056_v12  ;;  %v1066_v24 = vadd.f32 %v1064_v16, %v1057_v13  ;;  %v1242_v12 = vrot.slane %v2836_v2, 3 }
 0x56d   : > { %2377 = vpush %v1242_v12 }
 0x59e   : > { %s2378_s30 = spop %2377 }
 0x5a6   : > { %v955_v47 = vpop.f32.mrf.mxu0 }
 0x5a7   : > { %v960_v48 = vmul.f32 0.8, %v955_v47 }
 0x5a9   : > { %v962_v51 = vadd.f32 %v960_v48, %v2910_v27 }
 0x5ab   : > { %v964_v56 = vmul.f32 0.90468985, %v962_v51 }
 0x5ae   : > { %v957_v49 = vpop.f32.mrf.mxu0 }
 0x5af   : > { %v961_v50 = vmul.f32 0.8, %v957_v49 }
 0x5b1   : > { %v963_v52 = vadd.f32 %v961_v50, %v2913_v28 }
 0x5b3   : > { %v983_v53 = vpack.c.bf16 %v963_v52, %v962_v51  ;;  %v965_v63 = vmul.f32 0.90468985, %v963_v52  ;;  %v2324_v51 = vld [vmem:[%s2801_s15 + $0xb8] sm:$0xff]  ;;  %v2323_v52 = vld [vmem:[%s2801_s15 + $0xb0] sm:$0xff] }
 0x5b4   : > { %1222 = vmatpush.bf16.msra.mxu0 %v2324_v51 }
 0x5b5   : > { %1040 = vmatmul.bf16.vlgmr.msrb.gmra.mxu2 %v983_v53  ;;  %v2322_v53 = vld [vmem:[%s2801_s15 + $0xa8] sm:$0xff] }
 0x5b8   : > { %1223 = vmatpush.bf16.msra.mxu0 %v2323_v52 }
 0x5bc   : > { %1224 = vmatpush.bf16.msra.mxu0 %v2322_v53 }
 0x5c0   : > { %1225 = vmatpush.bf16.msra.mxu0 %v2321_v54 }
 0x638   : > { %v1041_v55 = vpop.f32.mrf.mxu2 }
 0x639   : > { %v1046_v57 = vmul.f32 0.09531018, %v1041_v55 }
 0x63b   : > { %v1048_v58 = vadd.f32 %v1046_v57, %v964_v56 }
 0x63d   : > { %v1050_v60 = vmax.f32 %v1048_v58, 0.0 }
 0x63f   : > { %v1068_v61 = vmul.f32 %v1067_v59, %v1050_v60 }
 0x640   : > { %v1043_v62 = vpop.f32.mrf.mxu2 }
 0x641   : > { %v1047_v0 = vmul.f32 0.09531018, %v1043_v62  ;;  %1070 = vadd.xlane.f32.xlu0 %v1068_v61  ;;  %v2320_v62 = vld [vmem:[%s2801_s15 + $0x98] sm:$0xff] }
 0x642   : > { %1226 = vmatpush.bf16.msra.mxu0 %v2320_v62 }
 0x643   : > { %v1049_v1 = vadd.f32 %v1047_v0, %v965_v63  ;;  %v2319_v63 = vld [vmem:[%s2801_s15 + $0x90] sm:$0xff]  ;;  %v2318_v0 = vld [vmem:[%s2801_s15 + $0x88] sm:$0xff] }
 0x645   : > { %v1051_v3 = vmax.f32 %v1049_v1, 0.0  ;;  %v2317_v1 = vld [vmem:[%s2801_s15 + $0x80] sm:$0xff] }
 0x646   : > { %1227 = vmatpush.bf16.msra.mxu0 %v2319_v63 }
 0x647   : > { %1090 = vmatpush.xpose.msrb.mxu1 %v1051_v3  ;;  %v1069_v4 = vmul.f32 %v1067_v59, %v1051_v3  ;;  %v1132_v5 = vpack.c.bf16 %v1051_v3, %v1050_v60 }
 0x649   : > { %1072 = vadd.xlane.f32.xlu0 %v1069_v4 }
 0x64a   : > { %1228 = vmatpush.bf16.msra.mxu0 %v2318_v0 }
 0x64b   : > { %1091 = vmatpush.xpose.msrb.mxu1 %v1050_v60 }
 0x64e   : > { %1092 = vmatmul.f32.vlgmr.msrb.gmra.mxu1 %v1074_v7  ;;  %1229 = vmatpush.bf16.msra.mxu0 %v2317_v1 }
 0x64f   : > { %1143 = vmatpush.bf16.msra.mxu1 %v1132_v5 }
 0x6b4   : > { %v1071_v8 = vpop.xlane.xlu0 %1070 }
 0x6bc   : > { %v1073_v26 = vpop.xlane.xlu0 %1072 }
 0x6cb   : > { %v1093_v18 = vpop.f32.mrf.mxu1 }
 0x6cc   : > { %v1096_v25 = vperm.slane %v1093_v18, 0 }
 0x6ce   : > { %v1097_v29 = vadd.f32 %v1096_v25, %v1071_v8  ;;  %v1098_v30 = vadd.f32 %v1096_v25, %v1073_v26 }
 0x6d0   : > { %v1099_v31 = vadd.f32 %v1097_v29, %v1065_v19  ;;  %v1100_v32 = vadd.f32 %v1098_v30, %v1066_v24  ;;  %v1257_v19 = vperm.slane %v2849_v6, 3 }
 0x6d2   : > { %vm1102_vm9 = vcmp.ge.f32.partialorder %v1100_v32, 0.0  ;;  %v1104_v33 = vmul.f32 0.2, %v1100_v32  ;;  %vm1101_vm10 = vcmp.ge.f32.partialorder %v1099_v31, 0.0  ;;  %v1103_v34 = vmul.f32 0.2, %v1099_v31 }
 0x6d4   : > { %v1106_v35 = vsel %vm1102_vm9, %v1100_v32, %v1104_v33  ;;  %v1105_v36 = vsel %vm1101_vm10, %v1099_v31, %v1103_v34 }
 0x6d5   : > { %v1108_v10 = vadd.f32 %v1106_v35, %v2890_v44  ;;  %v1107_v37 = vadd.f32 %v1105_v36, %v2892_v45  ;;  %v1264_v35 = vrot.slane %v2866_v17, 3 }
 0x6d7   : > { %v1112_v14 = vsel %vm726_vm6, %v1108_v10, -inf  ;;  %v1109_v38 = vsel %vm726_vm6, %v1107_v37, -inf }
 0x6d8   : > { %1113 = vmax.xlane.f32.xlu1 %v1112_v14  ;;  %1110 = vmax.xlane.f32.xlu0 %v1109_v38 }
 0x74b   : > { %v1114_v39 = vpop.xlane.xlu1 %1113  ;;  %v1111_v40 = vpop.xlane.xlu0 %1110 }
 0x74c   : > { %v1116_v41 = vsub.f32 %v1108_v10, %v1114_v39  ;;  %v1115_v42 = vsub.f32 %v1107_v37, %v1111_v40  ;;  %v1244_v37 = vstv %s2378_s30 }
 0x74d   : > { %v1246_v38 = vmul.f32 %v2874_v20, %v1244_v37  ;;  %v1247_v39 = vmul.f32 %v2876_v21, %v1244_v37 }
 0x74e   : > { %v1119_v43 = vmul.f32 1.442695, %v1116_v41  ;;  %v1117_v46 = vmul.f32 1.442695, %v1115_v42 }
 0x750   : > { %2457 = vpow2.f32 %v1119_v43 }
 0x751   : > { %2459 = vpow2.f32 %v1117_v46 }
 0x756   : > { %v2458_v47 = vpop.eup %2457 }
 0x757   : > { %v2460_v48 = vpop.eup %2459  ;;  %v1124_v49 = vsel %vm726_vm6, %v2458_v47, 0.0 }
 0x758   : > { %1125 = vadd.xlane.f32.xlu0 %v1124_v49  ;;  %v1121_v50 = vsel %vm726_vm6, %v2460_v48, 0.0 }
 0x759   : > { %1122 = vadd.xlane.f32.xlu2 %v1121_v50 }
 0x771   : > { %1248 = vrot.lane.b32.xlu2 %v1242_v12, %s2623_s19  ;;  %v2330_v12 = vld [vmem:[%s2801_s15 + $0xe8] sm:$0xff] }
 0x7cb   : > { %v1126_v55 = vpop.xlane.xlu0 %1125 }
 0x7cc   : > { %v1123_v56 = vpop.xlane.xlu2 %1122  ;;  %2461 = vrcp.f32 %v1126_v55 }
 0x7cd   : > { %2463 = vrcp.f32 %v1123_v56 }
 0x7d2   : > { %v2462_v57 = vpop.eup %2461 }
 0x7d3   : > { %v2464_v58 = vpop.eup %2463  ;;  %v1130_v59 = vmul.f32 %v2462_v57, %v2458_v47 }
 0x7d4   : > { %v1129_v60 = vmul.f32 %v2464_v58, %v2460_v48  ;;  %v1249_v36 = vpop.permute.xlu2 %1248 }
 0x7d5   : > { %2379 = vpush %v1249_v36 }
 0x7d6   : > { %v1131_v61 = vpack.c.bf16 %v1130_v59, %v1129_v60 }
 0x7d8   : > { %2111 = vmatmul.msk.bf16.vlgmr.msra.gmra.mxu1 %vm726_vm6, %v1131_v61 }
 0x806   : > { %s2380_s25 = spop %2379 }
 0x807   : > { %v1251_v14 = vstv %s2380_s25  ;;  %s1792_s25 = scalar_lea.sflag [#allocation4], %s2797_s13 }
 0x808   : > { %v1253_v40 = vmul.f32 %v2878_v22, %v1251_v14  ;;  %v1254_v41 = vmul.f32 %v2880_v23, %v1251_v14 }
 0x80a   : > { %v1255_v43 = vadd.f32 %v1253_v40, %v1246_v38  ;;  %v1256_v46 = vadd.f32 %v1254_v41, %v1247_v39 }
 0x855   : > { %v1145_v3 = vpop.f32.mrf.mxu1 }
 0x856   : > { %v1150_v4 = vmul.f32 0.8, %v1145_v3 }
 0x858   : > { %v1152_v8 = vadd.f32 %v1150_v4, %v2910_v27 }
 0x85a   : > { %v1154_v15 = vmul.f32 0.93546146, %v1152_v8 }
 0x85d   : > { %v1147_v5 = vpop.f32.mrf.mxu1 }
 0x85e   : > { %v1151_v7 = vmul.f32 0.8, %v1147_v5 }
 0x860   : > { %v1153_v9 = vadd.f32 %v1151_v7, %v2913_v28 }
 0x862   : > { %v1173_v11 = vpack.c.bf16 %v1153_v9, %v1152_v8  ;;  %v1155_v29 = vmul.f32 0.93546146, %v1153_v9  ;;  %v2332_v9 = vld [vmem:[%s2801_s15 + $0xf8] sm:$0xff] }
 0x863   : > { %1412 = vmatpush.bf16.msra.mxu2 %v2332_v9 }
 0x864   : > { %1230 = vmatmul.bf16.vlgmr.msra.gmra.mxu0 %v1173_v11  ;;  %v2331_v11 = vld [vmem:[%s2801_s15 + $0xf0] sm:$0xff] }
 0x867   : > { %1413 = vmatpush.bf16.msra.mxu2 %v2331_v11 }
 0x86b   : > { %1414 = vmatpush.bf16.msra.mxu2 %v2330_v12 }
 0x8e1   : > { %v1231_v13 = vpop.f32.mrf.mxu0 }
 0x8e2   : > { %v1236_v16 = vmul.f32 0.06453852, %v1231_v13  ;;  %v2329_v13 = vld [vmem:[%s2801_s15 + $0xe0] sm:$0xff] }
 0x8e3   : > { %1415 = vmatpush.bf16.msra.mxu2 %v2329_v13 }
 0x8e4   : > { %v1238_v18 = vadd.f32 %v1236_v16, %v1154_v15 }
 0x8e6   : > { %v1240_v24 = vmax.f32 %v1238_v18, 0.0 }
 0x8e8   : > { %v1258_v25 = vmul.f32 %v1257_v19, %v1240_v24 }
 0x8e9   : > { %v1233_v26 = vpop.f32.mrf.mxu0 }
 0x8ea   : > { %v1237_v30 = vmul.f32 0.06453852, %v1233_v26  ;;  %1260 = vadd.xlane.f32.xlu0 %v1258_v25 }
 0x8ec   : > { %v1239_v31 = vadd.f32 %v1237_v30, %v1155_v29  ;;  %v2328_v29 = vld [vmem:[%s2801_s15 + $0xd8] sm:$0xff]  ;;  %v2327_v30 = vld [vmem:[%s2801_s15 + $0xd0] sm:$0xff] }
 0x8ed   : > { %1416 = vmatpush.bf16.msra.mxu2 %v2328_v29  ;;  %v2340_v29 = vld [vmem:[%s2801_s15 + $0x138] sm:$0xff] }
 0x8ee   : > { %v1241_v32 = vmax.f32 %v1239_v31, 0.0  ;;  %v2326_v31 = vld [vmem:[%s2801_s15 + $0xc8] sm:$0xff] }
 0x8f0   : > { %1280 = vmatpush.xpose.msrb.mxu1 %v1241_v32  ;;  %v1322_v33 = vpack.c.bf16 %v1241_v32, %v1240_v24  ;;  %v1259_v34 = vmul.f32 %v1257_v19, %v1241_v32  ;;  %v2325_v32 = vld [vmem:[%s2801_s15 + $0xc0] sm:$0xff] }
 0x8f1   : > { %1417 = vmatpush.bf16.msra.mxu2 %v2327_v30  ;;  %v2339_v30 = vld [vmem:[%s2801_s15 + $0x130] sm:$0xff] }
 0x8f2   : > { %1333 = vmatpush.bf16.msra.mxu3 %v1322_v33  ;;  %1262 = vadd.xlane.f32.xlu0 %v1259_v34  ;;  %v1432_v33 = vrot.slane %v2836_v2, 4  ;;  %v1447_v2 = vperm.slane %v2849_v6, 4 }
 0x8f4   : > { %1281 = vmatpush.xpose.msrb.mxu1 %v1240_v24  ;;  %1438 = vrot.lane.b32.xlu1 %v1432_v33, %s2623_s19  ;;  %2381 = vpush %v1432_v33 }
 0x8f5   : > { %1418 = vmatpush.bf16.msra.mxu2 %v2326_v31  ;;  %v2338_v31 = vld [vmem:[%s2801_s15 + $0x128] sm:$0xff] }
 0x8f6   : > { %1602 = vmatpush.bf16.msrb.mxu3 %v2340_v29 }
 0x8f7   : > { %1282 = vmatmul.f32.vlgmr.msrb.gmra.mxu1 %v1264_v35 }
 0x8f9   : > { %1419 = vmatpush.bf16.msra.mxu2 %v2325_v32  ;;  %v2337_v32 = vld [vmem:[%s2801_s15 + $0x120] sm:$0xff] }
 0x8fa   : > { %1603 = vmatpush.bf16.msrb.mxu3 %v2339_v30 }
 0x8fe   : > { %1604 = vmatpush.bf16.msrb.mxu3 %v2338_v31 }
 0x902   : > { %1605 = vmatpush.bf16.msrb.mxu3 %v2337_v32 }
 0x925   : > { %s2382_s19 = spop %2381 }
 0x95d   : > { %v1261_v10 = vpop.xlane.xlu0 %1260 }
 0x965   : > { %v1263_v48 = vpop.xlane.xlu0 %1262 }
 0x966   : > { %v1439_v39 = vpop.permute.xlu1 %1438 }
 0x967   : > { %2383 = vpush %v1439_v39  ;;  %v2335_v39 = vld [vmem:[%s2801_s15 + $0x110] sm:$0xff] }
 0x974   : > { %v1283_v42 = vpop.f32.mrf.mxu1 }
 0x975   : > { %v1286_v47 = vperm.slane %v1283_v42, 0 }
 0x977   : > { %v1287_v49 = vadd.f32 %v1286_v47, %v1261_v10  ;;  %v1288_v50 = vadd.f32 %v1286_v47, %v1263_v48 }
 0x979   : > { %v1289_v51 = vadd.f32 %v1287_v49, %v1255_v43  ;;  %v1290_v52 = vadd.f32 %v1288_v50, %v1256_v46 }
 0x97b   : > { %vm1291_vm11 = vcmp.ge.f32.partialorder %v1289_v51, 0.0  ;;  %v1293_v53 = vmul.f32 0.2, %v1289_v51  ;;  %vm1292_vm12 = vcmp.ge.f32.partialorder %v1290_v52, 0.0  ;;  %v1294_v54 = vmul.f32 0.2, %v1290_v52 }
 0x97d   : > { %v1295_v55 = vsel %vm1291_vm11, %v1289_v51, %v1293_v53  ;;  %v1296_v56 = vsel %vm1292_vm12, %v1290_v52, %v1294_v54 }
 0x97e   : > { %v1297_v57 = vadd.f32 %v1295_v55, %v2892_v45  ;;  %v1298_v58 = vadd.f32 %v1296_v56, %v2890_v44  ;;  %v1454_v55 = vrot.slane %v2866_v17, 4  ;;  %v1434_v56 = vstv %s2382_s19 }
 0x980   : > { %v1299_v59 = vsel %vm726_vm6, %v1297_v57, -inf  ;;  %v1302_v60 = vsel %vm726_vm6, %v1298_v58, -inf }
 0x981   : > { %1300 = vmax.xlane.f32.xlu0 %v1299_v59  ;;  %1303 = vmax.xlane.f32.xlu2 %v1302_v60  ;;  %v1437_v59 = vmul.f32 %v2876_v21, %v1434_v56 }
 0x998   : > { %s2384_s29 = spop %2383 }
 0x9f4   : > { %v1301_v61 = vpop.xlane.xlu0 %1300  ;;  %v1304_v62 = vpop.xlane.xlu2 %1303 }
 0x9f5   : > { %v1305_v63 = vsub.f32 %v1297_v57, %v1301_v61  ;;  %v1306_v1 = vsub.f32 %v1298_v58, %v1304_v62  ;;  %v1441_v57 = vstv %s2384_s29  ;;  %v1436_v58 = vmul.f32 %v2874_v20, %v1434_v56 }
 0x9f6   : > { %v1443_v60 = vmul.f32 %v2878_v22, %v1441_v57  ;;  %v1444_v61 = vmul.f32 %v2880_v23, %v1441_v57 }
 0x9f7   : > { %v1307_v0 = vmul.f32 1.442695, %v1305_v63  ;;  %v1309_v3 = vmul.f32 1.442695, %v1306_v1 }
 0x9f8   : > { %v1445_v63 = vadd.f32 %v1443_v60, %v1436_v58 }
 0x9f9   : > { %2465 = vpow2.f32 %v1307_v0  ;;  %v1446_v0 = vadd.f32 %v1444_v61, %v1437_v59 }
 0x9fa   : > { %2467 = vpow2.f32 %v1309_v3 }
 0x9ff   : > { %v2466_v4 = vpop.eup %2465 }
 0xa00   : > { %v1311_v5 = vsel %vm726_vm6, %v2466_v4, 0.0  ;;  %v2468_v7 = vpop.eup %2467 }
 0xa01   : > { %1312 = vadd.xlane.f32.xlu0 %v1311_v5  ;;  %v1314_v8 = vsel %vm726_vm6, %v2468_v7, 0.0 }
 0xa09   : > { %1315 = vadd.xlane.f32.xlu0 %v1314_v8 }
 0xa74   : > { %v1313_v15 = vpop.xlane.xlu0 %1312 }
 0xa75   : > { %2469 = vrcp.f32 %v1313_v15 }
 0xa7b   : > { %v2470_v18 = vpop.eup %2469 }
 0xa7c   : > { %v1316_v16 = vpop.xlane.xlu0 %1315  ;;  %v1319_v24 = vmul.f32 %v2470_v18, %v2466_v4 }
 0xa7d   : > { %2471 = vrcp.f32 %v1316_v16 }
 0xa83   : > { %v2472_v19 = vpop.eup %2471 }
 0xa84   : > { %v1320_v25 = vmul.f32 %v2472_v19, %v2468_v7 }
 0xa86   : > { %v1321_v26 = vpack.c.bf16 %v1320_v25, %v1319_v24 }
 0xa88   : > { %2160 = vmatmul.msk.bf16.vlgmr.msra.gmra.mxu3 %vm726_vm6, %v1321_v26 }
 0xb0b   : > { %v1335_v34 = vpop.f32.mrf.mxu3 }
 0xb0c   : > { %v1340_v35 = vmul.f32 0.8, %v1335_v34 }
 0xb0e   : > { %v1342_v37 = vadd.f32 %v1340_v35, %v2910_v27 }
 0xb10   : > { %v1344_v41 = vmul.f32 0.95120984, %v1342_v37 }
 0xb13   : > { %v1337_v36 = vpop.f32.mrf.mxu3 }
 0xb14   : > { %v1341_v10 = vmul.f32 0.8, %v1337_v36 }
 0xb16   : > { %v1343_v14 = vadd.f32 %v1341_v10, %v2913_v28 }
 0xb18   : > { %v1363_v38 = vpack.c.bf16 %v1343_v14, %v1342_v37  ;;  %v1345_v49 = vmul.f32 0.95120984, %v1343_v14 }
 0xb1a   : > { %1420 = vmatmul.bf16.vlgmr.msra.gmra.mxu2 %v1363_v38  ;;  %v2336_v38 = vld [vmem:[%s2801_s15 + $0x118] sm:$0xff] }
 0xb1b   : > { %1606 = vmatpush.bf16.msrb.mxu3 %v2336_v38 }
 0xb1f   : > { %1607 = vmatpush.bf16.msrb.mxu3 %v2335_v39 }
 0xb9d   : > { %v1421_v40 = vpop.f32.mrf.mxu2 }
 0xb9e   : > { %v1426_v42 = vmul.f32 0.048790164, %v1421_v40  ;;  %v2334_v40 = vld [vmem:[%s2801_s15 + $0x108] sm:$0xff] }
 0xb9f   : > { %1608 = vmatpush.bf16.msrb.mxu3 %v2334_v40 }
 0xba0   : > { %v1428_v43 = vadd.f32 %v1426_v42, %v1344_v41  ;;  %v2333_v41 = vld [vmem:[%s2801_s15 + $0x100] sm:$0xff] }
 0xba2   : > { %v1430_v46 = vmax.f32 %v1428_v43, 0.0 }
 0xba3   : > { %1609 = vmatpush.bf16.msrb.mxu3 %v2333_v41 }
 0xba4   : > { %v1448_v47 = vmul.f32 %v1447_v2, %v1430_v46 }
 0xba5   : > { %v1423_v48 = vpop.f32.mrf.mxu2 }
 0xba6   : > { %v1427_v50 = vmul.f32 0.048790164, %v1423_v48  ;;  %1450 = vadd.xlane.f32.xlu0 %v1448_v47 }
 0xba8   : > { %v1429_v51 = vadd.f32 %v1427_v50, %v1345_v49  ;;  %v3021_v50 = vld [vmem:[%s588_s26] sm:$0x3] }
 0xbaa   : > { %v1431_v52 = vmax.f32 %v1429_v51, 0.0  ;;  %v1624_v51 = vsel %vm1623_vm15, %v3021_v50, 0.0 }
 0xbac   : > { %1470 = vmatpush.xpose.msra.mxu1 %v1431_v52  ;;  %v1449_v53 = vmul.f32 %v1447_v2, %v1431_v52  ;;  %v1512_v54 = vpack.c.bf16 %v1431_v52, %v1430_v46  ;;  %v2348_v52 = vld [vmem:[%s2809_s22 + $0x38] sm:$0xff] }
 0xbae   : > { %1452 = vadd.xlane.f32.xlu0 %v1449_v53  ;;  %v2347_v53 = vld [vmem:[%s2809_s22 + $0x30] sm:$0xff] }
 0xbb0   : > { %1471 = vmatpush.xpose.msra.mxu1 %v1430_v46 }
 0xbb3   : > { %1472 = vmatmul.f32.vlgmr.msra.gmra.mxu1 %v1454_v55 }
 0xbb4   : > { %1523 = vmatpush.bf16.msrb.mxu1 %v1512_v54 }
 0xbb8   : > { %1725 = vmatpush.bf16.msra.mxu1 %v2348_v52 }
 0xbbc   : > { %1726 = vmatpush.bf16.msra.mxu1 %v2347_v53 }
 0xc19   : > { %v1451_v6 = vpop.xlane.xlu0 %1450 }
 0xc21   : > { %v1453_v1 = vpop.xlane.xlu0 %1452 }
 0xc30   : > { %v1473_v62 = vpop.f32.mrf.mxu1 }
 0xc31   : > { %v1476_v17 = vperm.slane %v1473_v62, 0 }
 0xc33   : > { %v1477_v3 = vadd.f32 %v1476_v17, %v1451_v6  ;;  %v1478_v4 = vadd.f32 %v1476_v17, %v1453_v1  ;;  %v2344_v17 = vld [vmem:[%s2809_s22 + $0x18] sm:$0xff]  ;;  %v2343_v1 = vld [vmem:[%s2809_s22 + $0x10] sm:$0xff] }
 0xc35   : > { %v1479_v5 = vadd.f32 %v1477_v3, %v1445_v63  ;;  %v1480_v7 = vadd.f32 %v1478_v4, %v1446_v0  ;;  %v1627_v63 = vpack.c.bf16 %v3021_v50, %v3021_v50  ;;  %v2345_v0 = vld [vmem:[%s2809_s22 + $0x20] sm:$0xff]  ;;  %v2342_v3 = vld [vmem:[%s2809_s22 + $0x8] sm:$0xff] }
 0xc36   : > { %v2341_v4 = vld [vmem:[%s2809_s22] sm:$0xff] }
 0xc37   : > { %vm1481_vm13 = vcmp.ge.f32.partialorder %v1479_v5, 0.0  ;;  %v1483_v8 = vmul.f32 0.2, %v1479_v5  ;;  %vm1482_vm14 = vcmp.ge.f32.partialorder %v1480_v7, 0.0  ;;  %v1484_v9 = vmul.f32 0.2, %v1480_v7 }
 0xc39   : > { %v1485_v20 = vsel %vm1481_vm13, %v1479_v5, %v1483_v8  ;;  %v1486_v11 = vsel %vm1482_vm14, %v1480_v7, %v1484_v9 }
 0xc3a   : > { %v1487_v21 = vadd.f32 %v1485_v20, %v2892_v45  ;;  %v1488_v22 = vadd.f32 %v1486_v11, %v2890_v44 }
 0xc3c   : > { %v1489_v23 = vsel %vm726_vm6, %v1487_v21, -inf  ;;  %v1492_v12 = vsel %vm726_vm6, %v1488_v22, -inf }
 0xc3d   : > { %1490 = vmax.xlane.f32.xlu0 %v1489_v23  ;;  %1493 = vmax.xlane.f32.xlu1 %v1492_v12 }
 0xcb0   : > { %v1494_v13 = vpop.xlane.xlu1 %1493  ;;  %v1491_v15 = vpop.xlane.xlu0 %1490 }
 0xcb1   : > { %v1496_v16 = vsub.f32 %v1488_v22, %v1494_v13  ;;  %v1495_v18 = vsub.f32 %v1487_v21, %v1491_v15 }
 0xcb3   : > { %v1499_v19 = vmul.f32 1.442695, %v1496_v16  ;;  %v1497_v24 = vmul.f32 1.442695, %v1495_v18 }
 0xcb5   : > { %2473 = vpow2.f32 %v1499_v19 }
 0xcb6   : > { %2475 = vpow2.f32 %v1497_v24 }
 0xcbb   : > { %v2474_v45 = vpop.eup %2473 }
 0xcbc   : > { %v2476_v44 = vpop.eup %2475  ;;  %v1504_v25 = vsel %vm726_vm6, %v2474_v45, 0.0 }
 0xcbd   : > { %1505 = vadd.xlane.f32.xlu2 %v1504_v25  ;;  %v1501_v26 = vsel %vm726_vm6, %v2476_v44, 0.0 }
 0xcbe   : > { %1502 = vadd.xlane.f32.xlu0 %v1501_v26 }
 0xcc6   : > { %1625 = vadd.xlane.f32.xlu0 %v1624_v51 }
 0xd30   : > { %v1506_v33 = vpop.xlane.xlu2 %1505 }
 0xd31   : > { %2477 = vrcp.f32 %v1506_v33  ;;  %v1503_v34 = vpop.xlane.xlu0 %1502 }
 0xd32   : > { %2479 = vrcp.f32 %v1503_v34 }
 0xd37   : > { %v2478_v35 = vpop.eup %2477 }
 0xd38   : > { %v2480_v36 = vpop.eup %2479  ;;  %v1510_v10 = vmul.f32 %v2478_v35, %v2474_v45 }
 0xd39   : > { %v1509_v37 = vmul.f32 %v2480_v36, %v2476_v44  ;;  %v1626_v5 = vpop.xlane.xlu0 %1625 }
 0xd3a   : > { %2481 = vrcp.f32 %v1626_v5  ;;  %vm1650_vm0 = vweird.f32 %v1626_v5  ;;  %v1656_v11 = vand.u32 2147483648, %v1626_v5  ;;  %v1654_v22 = vand.u32 2147483647, %v1626_v5 }
 0xd3b   : > { %v1511_v14 = vpack.c.bf16 %v1510_v10, %v1509_v37 }
 0xd3c   : > { %v1657_v23 = vor.u32 1.1754944e-38, %v1656_v11  ;;  %vm1655_vm3 = vcmp.eq.f32.partialorder %v1654_v22, 8.507059e+37 }
 0xd3d   : > { %2209 = vmatmul.msk.bf16.vlgmr.msrb.gmra.mxu1 %vm726_vm6, %v1511_v14 }
 0xd40   : > { %v2482_v7 = vpop.eup %2481 }
 0xd41   : > { %v1646_v8 = vmul.f32 %v2482_v7, %v1626_v5  ;;  %vm1651_vm1 = vweird.f32 %v2482_v7 }
 0xd42   : > { %vm1652_vm2 = vmor %vm1650_vm0, %vm1651_vm1 }
 0xd43   : > { %v1647_v9 = vsub.f32 1.0, %v1646_v8 }
 0xd45   : > { %v1648_v20 = vmul.f32 %v2482_v7, %v1647_v9 }
 0xd47   : > { %v1649_v21 = vadd.f32 %v2482_v7, %v1648_v20 }
 0xd49   : > { %v1653_v12 = vsel %vm1652_vm2, %v2482_v7, %v1649_v21 }
 0xd4a   : > { %v1658_v15 = vsel %vm1655_vm3, %v1657_v23, %v1653_v12 }
 0xdba   : > { %v1525_v42 = vpop.f32.mrf.mxu1 }
 0xdbb   : > { %v1530_v43 = vmul.f32 0.8, %v1525_v42 }
 0xdbd   : > { %v1532_v47 = vadd.f32 %v1530_v43, %v2910_v27  ;;  %v2346_v27 = vld [vmem:[%s2809_s22 + $0x28] sm:$0xff]  ;;  %s2294_s22 = sshll.u32 %s2706_s21, 1 }
 0xdbe   : > { %1727 = vmatpush.bf16.msra.mxu1 %v2346_v27  ;;  %s1802_s9 = scalar_lea.hbm %s3110_s16, %s2294_s22 }
 0xdbf   : > { %v1534_v55 = vmul.f32 0.9607793, %v1532_v47  ;;  %s1806_s30 = sshll.u32 %s1802_s9, 4  ;;  %s1807_s30 = int_to_ptr.hbm [resolvable:$true] %s1806_s30 }
 0xdc0   : > { %s2563_s19 = sshra.s32 %s1807_s30, 4  ;;  %s2564_s19 = int_to_ptr.hbm [resolvable:$true] %s2563_s19 }
 0xdc1   : > { %s2565_s29 = scalar_lea.hbm %s2564_s19, 2  ;;  %p2570_p3 = scmp.lt.s32.totalorder %s2564_s19, %s3110_s16 }
 0xdc2   : > { %v1527_v2 = vpop.f32.mrf.mxu1  ;;  %1728 = vmatpush.bf16.msra.mxu1 %v2345_v0  ;;  %p2566_p6 = scmp.ne.s32.totalorder %s2564_s19, %s2565_s29  ;;  %p2571_p4 = scmp.lt.s32.totalorder %s2569_s28, %s2565_s29 }
 0xdc3   : > { %v1531_v46 = vmul.f32 0.8, %v1527_v2 }
 0xdc4   : > { %p2567_p1 = pnand %p2566_p6, %p2731_p11  ;;  %p2572_p5 = por %p2571_p4, %p2570_p3 }
 0xdc5   : > { %v1533_v48 = vadd.f32 %v1531_v46, %v2913_v28 }
 0xdc6   : > { %1729 = vmatpush.bf16.msra.mxu1 %v2344_v17  ;;  %p2568_p2 = pneg %p2567_p1 }
 0xdc7   : > { %v1553_v49 = vpack.c.bf16 %v1533_v48, %v1532_v47  ;;  %v1535_v57 = vmul.f32 0.9607793, %v1533_v48 }
 0xdc8   : > { %p2573_p7 = pnand %p2572_p5, %p2568_p2 }
 0xdc9   : > { %1610 = vmatmul.bf16.vlgmr.msrb.gmra.mxu3 %v1553_v49 }
 0xdca   : > { %1730 = vmatpush.bf16.msra.mxu1 %v2343_v1 }
 0xdce   : > { %1731 = vmatpush.bf16.msra.mxu1 %v2342_v3 }
 0xdd2   : > { %1732 = vmatpush.bf16.msra.mxu1 %v2341_v4 }
 0xe4c   : > { %v1611_v28 = vpop.f32.mrf.mxu3 }
 0xe4d   : > { %v1616_v54 = vmul.f32 0.039220713, %v1611_v28 }
 0xe4f   : > { %v1618_v56 = vadd.f32 %v1616_v54, %v1534_v55 }
 0xe51   : > { %v1620_v60 = vmax.f32 %v1618_v56, 0.0 }
 0xe54   : > { %v1613_v6 = vpop.f32.mrf.mxu3 }
 0xe55   : > { %v1617_v58 = vmul.f32 0.039220713, %v1613_v6 }
 0xe57   : > { %v1619_v59 = vadd.f32 %v1617_v58, %v1535_v57 }
 0xe59   : > { %v1621_v61 = vmax.f32 %v1619_v59, 0.0 }
 0xe5b   : > { %v1628_v62 = vpack.c.bf16 %v1621_v61, %v1620_v60 }
 0xe5d   : > { %1639 = vmatpush.bf16.msrb.mxu0 %v1628_v62  ;;  %1784 = vmatpush.bf16.msrb.mxu2 %v1628_v62 }
 0xe60   : > { %2258 = vmatmul.msk.bf16.vlgmr.msrb.gmra.mxu0 %vm726_vm6, %v1627_v63 }
 0xe61   : > { %1747 = vmatpush.bf16.xpose.msra.mxu0 %v1628_v62 }
 0xedd   : > { %v1641_v13 = vpop.f32.mrf.mxu0 }
 0xede   : > { %v1659_v16 = vmul.f32 %v1658_v15, %v1641_v13 }
 0xee0   : > { %v1676_v18 = vpack.c.bf16 %v1659_v16, %v1659_v16 }
 0xee2   : > { %1733 = vmatmul.bf16.vlgmr.msra.gmra.mxu1 %v1676_v18 }
 0xee5   : > { %v1643_v19 = vpop.f32.mrf.mxu0 }
 0xf5f   : > { %v1734_v24 = vpop.f32.mrf.mxu1 }
 0xf60   : > { %2483 = vtanh.f32 %v1734_v24 }
 0xf66   : > { %v2484_v45 = vpop.eup %2483 }
 0xf67   : > { %v1739_v44 = vpack.c.bf16 %v2484_v45, %v2484_v45  ;;  %v1736_v25 = vpop.f32.mrf.mxu1 }
 0xf69   : > { %1748 = vmatmul.bf16.vlgmr.msra.gmra.mxu0 %v1739_v44 }
 0xfe6   : > { %v1749_v26 = vpop.f32.mrf.mxu0 }
 0xfe7   : > { %v2291_v29 = vmul.f32 -1.442695, %v1749_v26 }
 0xfe9   : > { %2485 = vpow2.f32 %v2291_v29 }
 0xfee   : > { %v1751_v30 = vpop.f32.mrf.mxu0 }
 0xfef   : > { %v2486_v31 = vpop.eup %2485 }
 0xff0   : > { %v1756_v32 = vadd.f32 1.0, %v2486_v31 }
 0xff2   : > { %2487 = vrcp.f32 %v1756_v32  ;;  %v1768_v36 = vand.u32 2147483648, %v1756_v32  ;;  %v1766_v37 = vand.u32 2147483647, %v1756_v32  ;;  %vm1762_vm5 = vweird.f32 %v1756_v32 }
 0xff4   : > { %v1769_v38 = vor.u32 1.1754944e-38, %v1768_v36  ;;  %vm1767_vm8 = vcmp.eq.f32.partialorder %v1766_v37, 8.507059e+37 }
 0xff8   : > { %v2488_v33 = vpop.eup %2487 }
 0xff9   : > { %v1758_v34 = vmul.f32 %v2488_v33, %v1756_v32  ;;  %vm1763_vm4 = vweird.f32 %v2488_v33 }
 0xffa   : > { %vm1764_vm7 = vmor %vm1762_vm5, %vm1763_vm4 }
 0xffb   : > { %v1759_v35 = vsub.f32 1.0, %v1758_v34 }
 0xffd   : > { %v1760_v10 = vmul.f32 %v2488_v33, %v1759_v35 }
 0xfff   : > { %v1761_v14 = vadd.f32 %v2488_v33, %v1760_v10 }
0x1001   : > { %v1765_v39 = vsel %vm1764_vm7, %v2488_v33, %v1761_v14 }
0x1002   : > { %v1770_v40 = vsel %vm1767_vm8, %v1769_v38, %v1765_v39 }
0x1003   : > { %v1772_v41 = vmul.f32 %v1770_v40, %v3021_v50 }
0x1005   : > { %v1773_v42 = vpack.c.bf16 %v1772_v41, %v1772_v41 }
0x1007   : > { %2292 = vmatmul.msk.bf16.vlgmr.msrb.gmra.mxu2 %vm726_vm6, %v1773_v42 }
0x108a   : > { %v1786_v43 = vpop.f32.mrf.mxu2 }
0x108b   : > { %1790 = vst [vmem:[%s569_s17] sm:$0x3] %v1786_v43 }
0x108c   : > { %2576 = shalt.err (!%p2573_p7)
}
0x108d   : > { %2389 = dma.vmem_to_hbm [thread:$0]  (%p2731_p11), %s1805_s12, 32, %s1807_s30, %s1792_s25  }
0x1092   : > { %v1788_v2 = vpop.f32.mrf.mxu2 }
0x1093 PF: > { %s3111_s13 = sld [smem:[#allocation11_spill]]  ;;  %p2399_p8 = pnand %p2007_p9, %p2735_p12 }
0x1095   : > { %p2400_p10 = pneg %p2399_p8 }
0x1099   : > { %s1818_s23 = sand.u32 1, %s3111_s13  }
0x109a   : > { %s1819_s24 = scalar_lea.sflag [#allocation4], %s1818_s23 }
0x109b   : > { %2602 = dma.done.wait (%p2400_p10), %s1819_s24, 32  }
0x109c   : > { %2604 = vsyncadd (%p2400_p10), %s1819_s24, 4294967264  ;;  %s3113_s20 = sld [smem:[#allocation13_spill]]  ;;  %s3116_s17 = smov %s2611_s18 }
0x109d   : > { %s3114_s27 = sld [smem:[#allocation12_spill]] }
0x109e   : > { %s3115_s19 = sld [smem:[#allocation14_spill]] }
0x10a2   : > { %p27_p0 = scmp.ge.s32.totalorder %s3113_s20, 4  }
0x10a3   : > { %s3117_s18 = smov %s3114_s27 }
0x10a4   :  { %29 = sbr.rel (!%p27_p0) target bundleno = 10 (0xa), region = 153 }
0x10a9   :  { %1825 = vsyncpa [#allocation3], 1 }
0x10aa   :  { %1827 = vsyncpa [#allocation3 + $0x1], 1 }
0x10ab   :  { %1828 = vsyncpa [#allocation6], 1 }
0x10ac   :  { %1830 = vsyncpa [#allocation6 + $0x1], 1 }
0x10ad   :  { %1831 = vsyncpa [#allocation4], 1 }
0x10ae   :  { %1833 = vsyncpa [#allocation4 + $0x1], 1 }

</bundles_post_ra>
